<compile_context>
chip_gen: v7x
topology: tpu7x:2x2x1
jax: 0.10.0
libtpu: 0.0.40
codegen_flags: <defaults>
</compile_context>

<pallas_src>
import jax
import jax.numpy as jnp
from jax.experimental import pallas as pl
from jax.experimental.pallas import tpu as pltpu

# ---- model config (matches ParityTransformer defaults) ----------------------
NUM_TOKENS = 2
NUM_CLASSES = 2
D_MODEL = 64
NHEAD = 4
HEAD_DIM = D_MODEL // NHEAD
NUM_LAYERS = 2
DIM_FF = 128
MAX_SEQ_LEN = 20
LN_EPS = 1e-5

# packed weight-slab lane offsets (per layer, all weights stored (in, out));
# the slab row width is a whole number of 128-lane vregs.
W64_IN = 0                       # in_proj_w^T : lanes [0, 192)
W64_FF1 = 256                    # ff_w1^T     : lanes [256, 384)
W64_OUT = 384                    # out_proj^T  : lanes [384, 448)
W64_FC = 512                     # fc_out^T (padded to 128 lanes, layer 0 only)
FC_PAD = 128
W64_WIDTH = 640                  # 5 vregs / row

# packed bias-slab row indices (per layer; rows zero-padded to 3*D_MODEL lanes)
(B_INPROJ, B_OUTPROJ, B_LN1W, B_LN1B,
 B_FF1, B_FF2, B_LN2W, B_LN2B, B_FC) = range(9)
NUM_BIAS_ROWS = 9


def _layer_norm(x, w, b):
    mean = jnp.mean(x, axis=-1, keepdims=True)
    var = jnp.mean((x - mean) ** 2, axis=-1, keepdims=True)
    return (x - mean) * jax.lax.rsqrt(var + LN_EPS) * w + b


def transformer_kernel(x_ref, w64_ref, wff2_ref, bias_ref, o_ref):
    TB, S, D = x_ref.shape
    N = TB * S

    x = x_ref[...].astype(jnp.float32).reshape(N, D)            # residual (f32)

    for l in range(NUM_LAYERS):                                  # static unroll
        in_w = w64_ref[l, :, W64_IN:W64_IN + 3 * D]              # (D, 3D)  bf16
        ff_w1 = w64_ref[l, :, W64_FF1:W64_FF1 + DIM_FF]          # (D, FF)  bf16
        out_w = w64_ref[l, :, W64_OUT:W64_OUT + D]               # (D, D)   bf16
        ff_w2 = wff2_ref[l]                                      # (FF, D)  bf16

        in_b = bias_ref[l, B_INPROJ:B_INPROJ + 1, :]             # (1, 3D) f32
        out_b = bias_ref[l, B_OUTPROJ:B_OUTPROJ + 1, 0:D]
        ln1_w = bias_ref[l, B_LN1W:B_LN1W + 1, 0:D]
        ln1_b = bias_ref[l, B_LN1B:B_LN1B + 1, 0:D]
        ff_b1 = bias_ref[l, B_FF1:B_FF1 + 1, 0:DIM_FF]
        ff_b2 = bias_ref[l, B_FF2:B_FF2 + 1, 0:D]
        ln2_w = bias_ref[l, B_LN2W:B_LN2W + 1, 0:D]
        ln2_b = bias_ref[l, B_LN2B:B_LN2B + 1, 0:D]

        # --------- multi-head self attention (post-norm encoder layer) ------
        qkv = jnp.dot(x.astype(jnp.bfloat16), in_w,
                      preferred_element_type=jnp.float32) + in_b        # (N, 3D)
        qkv3 = qkv.reshape(TB, S, 3 * D).astype(jnp.bfloat16)           # (TB,S,3D)

        # head-batched q/k/v: (NHEAD*TB, S, HEAD_DIM), head-major on axis 0
        qh = jnp.concatenate(
            [qkv3[:, :, h * HEAD_DIM:(h + 1) * HEAD_DIM]
             for h in range(NHEAD)], axis=0)
        kh = jnp.concatenate(
            [qkv3[:, :, D + h * HEAD_DIM:D + (h + 1) * HEAD_DIM]
             for h in range(NHEAD)], axis=0)
        vh = jnp.concatenate(
            [qkv3[:, :, 2 * D + h * HEAD_DIM:2 * D + (h + 1) * HEAD_DIM]
             for h in range(NHEAD)], axis=0)

        # scores (the 1/sqrt(head_dim) scale is pre-folded into Wq/bq)
        s = jnp.einsum('bqd,bkd->bqk', qh, kh,
                       preferred_element_type=jnp.float32)       # (H*TB, S, S)
        m = jnp.max(s, axis=-1, keepdims=True)
        e = jnp.exp(s - m)
        p = (e * pl.reciprocal(jnp.sum(e, axis=-1, keepdims=True),
                               approx=True)).astype(jnp.bfloat16)
        ctx = jnp.einsum('bqk,bkd->bqd', p, vh,
                         preferred_element_type=jnp.float32)     # (H*TB, S, hd)

        # fold each head's context straight into the output projection
        attn = jnp.broadcast_to(out_b, (N, D)).astype(jnp.float32)
        for h in range(NHEAD):                                   # static (4)
            attn = attn + jnp.dot(
                ctx[h * TB:(h + 1) * TB].reshape(N, HEAD_DIM).astype(jnp.bfloat16),
                out_w[h * HEAD_DIM:(h + 1) * HEAD_DIM, :],
                preferred_element_type=jnp.float32)

        x = _layer_norm(x + attn, ln1_w, ln1_b)

        # --------- feed-forward (ReLU) ---------------------------------------
        h1 = jnp.dot(x.astype(jnp.bfloat16), ff_w1,
                     preferred_element_type=jnp.float32) + ff_b1
        h1 = jnp.maximum(h1, 0.0)
        ff = jnp.dot(h1.astype(jnp.bfloat16), ff_w2,
                     preferred_element_type=jnp.float32) + ff_b2

        x = _layer_norm(x + ff, ln2_w, ln2_b)

    # --------- fc_out(transformer_out[-1]): last sequence position ----------
    last = x.reshape(TB, S, D)[:, S - 1, :]                      # (TB, D) static
    fc_w = w64_ref[0, :, W64_FC:W64_FC + FC_PAD]                 # (D, 128) bf16
    fc_b = bias_ref[0, B_FC:B_FC + 1, 0:FC_PAD]                  # (1, 128) f32
    logits = jnp.dot(last.astype(jnp.bfloat16), fc_w,
                     preferred_element_type=jnp.float32) + fc_b
    o_ref[...] = logits                                          # lane-dense store


def pack_params(params):
    """Host-side (call ONCE per parameter set): pre-transpose all weights to
    (in, out), fold the 1/sqrt(head_dim) attention scale into Wq/bq, and pack
    everything into two bf16 weight slabs + one f32 bias slab."""
    L, D = NUM_LAYERS, D_MODEL
    scale = 1.0 / (HEAD_DIM ** 0.5)

    in_w_t = jnp.transpose(params['in_proj_w'], (0, 2, 1))       # (L, D, 3D)
    in_w_t = in_w_t.at[:, :, :D].multiply(scale)                 # fold scale: Wq
    ff1_t = jnp.transpose(params['ff_w1'], (0, 2, 1))            # (L, D, FF)
    out_w_t = jnp.transpose(params['out_proj_w'], (0, 2, 1))     # (L, D, D)

    fc_block = jnp.zeros((L, D, FC_PAD), jnp.float32)            # (L, D, 128)
    fc_block = fc_block.at[0, :, :NUM_CLASSES].set(jnp.transpose(params['fc_w']))

    pad1 = jnp.zeros((L, D, W64_FF1 - 3 * D), jnp.float32)
    pad2 = jnp.zeros((L, D, W64_FC - (W64_OUT + D)), jnp.float32)
    w64 = jnp.concatenate([in_w_t, pad1, ff1_t, out_w_t, pad2, fc_block],
                          axis=-1).astype(jnp.bfloat16)          # (L, D, 640)

    wff2 = jnp.transpose(params['ff_w2'], (0, 2, 1)).astype(jnp.bfloat16)  # (L,FF,D)

    in_b = params['in_proj_b'].at[:, :D].multiply(scale)         # fold scale: bq
    fc_b = jnp.zeros((L, NUM_CLASSES), jnp.float32).at[0].set(params['fc_b'][0])

    def _row(v):
        return jnp.pad(v, ((0, 0), (0, 3 * D - v.shape[-1])))[:, None, :]

    bias = jnp.concatenate([
        _row(in_b), _row(params['out_proj_b']),
        _row(params['ln1_w']), _row(params['ln1_b']),
        _row(params['ff_b1']), _row(params['ff_b2']),
        _row(params['ln2_w']), _row(params['ln2_b']),
        _row(fc_b),
    ], axis=1).astype(jnp.float32)                               # (L, 9, 3D)

    return dict(w64=w64, wff2=wff2, bias=bias,
                embedding=params['embedding'],
                pos_encoder=params['pos_encoder'])


def _pick_batch_tile(batch, seq, cap=128):
    """Largest batch tile (MXU fill / per-step overhead), 8-aligned whenever it
    is not the full batch, and split into >=2 grid steps once each half still
    gives >=512 MXU rows so v7x's two TensorCores both get work."""
    if batch <= cap:
        if batch % 16 == 0 and (batch // 2) * seq >= 512:
            return batch // 2
        return batch
    for d in range(cap, 7, -1):
        if batch % d == 0 and d % 8 == 0:
            return d
    return batch      # awkward batch size: fall back to a single (full) tile


def parity_transformer_forward(src, packed):
    """src: (B, S) int32 tokens in {0,1}, with -1 marking padding.
    `packed`: output of pack_params (packed once, reused every call)."""
    # Matches the PyTorch forward with src_key_padding_mask=None: padded
    # positions get token-0 embeddings with zeroed positional encoding, and
    # attention is NOT masked.
    padding_mask = (src != -1)
    src_clean = src * padding_mask.astype(src.dtype)

    # glue: embedding / positional lookups (gathers) stay in plain JAX
    emb = packed['embedding'][src_clean]                              # (B, S, D)
    S = src.shape[1]
    pos = packed['pos_encoder'][:S]                                   # (S, D)
    x = emb + pos[None, :, :] * padding_mask[:, :, None].astype(emb.dtype)
    x = x.astype(jnp.bfloat16)                  # halve the activation DMA

    B = src.shape[0]
    TB = _pick_batch_tile(B, S)

    logits = pl.pallas_call(
        transformer_kernel,
        out_shape=jax.ShapeDtypeStruct((B, FC_PAD), jnp.float32),
        grid=(B // TB,),
        in_specs=[
            pl.BlockSpec((TB, S, D_MODEL), lambda i: (i, 0, 0)),
            pl.BlockSpec((NUM_LAYERS, D_MODEL, W64_WIDTH), lambda i: (0, 0, 0)),
            pl.BlockSpec((NUM_LAYERS, DIM_FF, D_MODEL), lambda i: (0, 0, 0)),
            pl.BlockSpec((NUM_LAYERS, NUM_BIAS_ROWS, 3 * D_MODEL),
                         lambda i: (0, 0, 0)),
        ],
        out_specs=pl.BlockSpec((TB, FC_PAD), lambda i: (i, 0)),
        compiler_params=pltpu.CompilerParams(
            dimension_semantics=("parallel",),
            vmem_limit_bytes=32 * 1024 * 1024),
    )(x, packed['w64'], packed['wff2'], packed['bias'])
    return logits[:, :NUM_CLASSES]          # drop the lane-dense padding


def init_params(key):
    def xavier(k, shape):
        fan_out, fan_in = shape[-2], shape[-1]
        bound = (6.0 / (fan_in + fan_out)) ** 0.5
        return jax.random.uniform(k, shape, jnp.float32, -bound, bound)

    keys = jax.random.split(key, 8)
    L = NUM_LAYERS
    return dict(
        embedding=xavier(keys[0], (NUM_TOKENS, D_MODEL)),
        pos_encoder=xavier(keys[1], (MAX_SEQ_LEN, D_MODEL)),
        in_proj_w=xavier(keys[2], (L, 3 * D_MODEL, D_MODEL)),
        in_proj_b=jnp.zeros((L, 3 * D_MODEL), jnp.float32),
        out_proj_w=xavier(keys[3], (L, D_MODEL, D_MODEL)),
        out_proj_b=jnp.zeros((L, D_MODEL), jnp.float32),
        ln1_w=jnp.ones((L, D_MODEL), jnp.float32),
        ln1_b=jnp.zeros((L, D_MODEL), jnp.float32),
        ff_w1=xavier(keys[4], (L, DIM_FF, D_MODEL)),
        ff_b1=jnp.zeros((L, DIM_FF), jnp.float32),
        ff_w2=xavier(keys[5], (L, D_MODEL, DIM_FF)),
        ff_b2=jnp.zeros((L, D_MODEL), jnp.float32),
        ln2_w=jnp.ones((L, D_MODEL), jnp.float32),
        ln2_b=jnp.zeros((L, D_MODEL), jnp.float32),
        fc_w=xavier(keys[6], (NUM_CLASSES, D_MODEL)),
        fc_b=jnp.zeros((1, NUM_CLASSES), jnp.float32),
    )


if __name__ == "__main__":
    key = jax.random.PRNGKey(0)
    pkey, dkey = jax.random.split(key)
    params = init_params(pkey)
    packed = pack_params(params)          # host-side repacking, done ONCE

    B, S = 2, 8
    src = jax.random.randint(dkey, (B, S), 0, NUM_TOKENS, dtype=jnp.int32)
    src = src.at[1, 6:].set(-1)           # tail padding on the second sequence

    fwd = jax.jit(parity_transformer_forward)
    out = jax.block_until_ready(fwd(src, packed))

    assert out.shape == (B, NUM_CLASSES)
    assert bool(jnp.all(jnp.isfinite(out)))
    print("KERNEL_OK")
</pallas_src>

<mosaic_0001>
module attributes {stable_mosaic.version = 11 : i64} {
  func.func @transformer_kernel(%arg0: i32, %arg1: memref<2x8x64xbf16, #tpu.memory_space<vmem>>, %arg2: memref<2x64x640xbf16, #tpu.memory_space<vmem>>, %arg3: memref<2x128x64xbf16, #tpu.memory_space<vmem>>, %arg4: memref<2x9x192xf32, #tpu.memory_space<vmem>>, %arg5: memref<2x128xf32, #tpu.memory_space<vmem>>) attributes {dimension_semantics = [#tpu.dimension_semantics<parallel>], iteration_bounds = array<i64: 1>, scalar_prefetch = 0 : i64, scratch_operands = 0 : i64, tpu.core_type = #tpu.core_type<tc>, window_params = [{transform_indices = @transform_0, window_bounds = array<i64: 2, 8, 64>}, {pipeline_mode = #tpu.pipeline_mode<synchronous>, transform_indices = @transform_1, window_bounds = array<i64: 2, 64, 640>}, {pipeline_mode = #tpu.pipeline_mode<synchronous>, transform_indices = @transform_2, window_bounds = array<i64: 2, 128, 64>}, {pipeline_mode = #tpu.pipeline_mode<synchronous>, transform_indices = @transform_3, window_bounds = array<i64: 2, 9, 192>}, {transform_indices = @transform_4, window_bounds = array<i64: 2, 128>}]} {
    %c0 = arith.constant 0 : index
    %c0_0 = arith.constant 0 : index
    %c0_1 = arith.constant 0 : index
    %0 = vector.load %arg1[%c0, %c0_0, %c0_1] : memref<2x8x64xbf16, #tpu.memory_space<vmem>>, vector<2x8x64xbf16>
    %1 = arith.extf %0 : vector<2x8x64xbf16> to vector<2x8x64xf32>
    %2 = vector.shape_cast %1 : vector<2x8x64xf32> to vector<16x64xf32>
    %c0_2 = arith.constant 0 : index
    %c0_3 = arith.constant 0 : index
    %c0_4 = arith.constant 0 : index
    %3 = vector.load %arg2[%c0_2, %c0_3, %c0_4] : memref<2x64x640xbf16, #tpu.memory_space<vmem>>, vector<1x64x192xbf16>
    %4 = vector.shape_cast %3 : vector<1x64x192xbf16> to vector<64x192xbf16>
    %c0_5 = arith.constant 0 : index
    %c0_6 = arith.constant 0 : index
    %c256 = arith.constant 256 : index
    %5 = vector.load %arg2[%c0_5, %c0_6, %c256] : memref<2x64x640xbf16, #tpu.memory_space<vmem>>, vector<1x64x128xbf16>
    %6 = vector.shape_cast %5 : vector<1x64x128xbf16> to vector<64x128xbf16>
    %c0_7 = arith.constant 0 : index
    %c0_8 = arith.constant 0 : index
    %c384 = arith.constant 384 : index
    %7 = vector.load %arg2[%c0_7, %c0_8, %c384] : memref<2x64x640xbf16, #tpu.memory_space<vmem>>, vector<1x64x64xbf16>
    %8 = vector.shape_cast %7 : vector<1x64x64xbf16> to vector<64x64xbf16>
    %c0_9 = arith.constant 0 : index
    %c0_10 = arith.constant 0 : index
    %c0_11 = arith.constant 0 : index
    %9 = vector.load %arg3[%c0_9, %c0_10, %c0_11] : memref<2x128x64xbf16, #tpu.memory_space<vmem>>, vector<1x128x64xbf16>
    %10 = vector.shape_cast %9 : vector<1x128x64xbf16> to vector<128x64xbf16>
    %c0_12 = arith.constant 0 : index
    %c0_13 = arith.constant 0 : index
    %c0_14 = arith.constant 0 : index
    %11 = vector.load %arg4[%c0_12, %c0_13, %c0_14] : memref<2x9x192xf32, #tpu.memory_space<vmem>>, vector<1x1x192xf32>
    %12 = vector.shape_cast %11 : vector<1x1x192xf32> to vector<1x192xf32>
    %c0_15 = arith.constant 0 : index
    %c1 = arith.constant 1 : index
    %c0_16 = arith.constant 0 : index
    %13 = vector.load %arg4[%c0_15, %c1, %c0_16] : memref<2x9x192xf32, #tpu.memory_space<vmem>>, vector<1x1x64xf32>
    %14 = vector.shape_cast %13 : vector<1x1x64xf32> to vector<1x64xf32>
    %c0_17 = arith.constant 0 : index
    %c2 = arith.constant 2 : index
    %c0_18 = arith.constant 0 : index
    %15 = vector.load %arg4[%c0_17, %c2, %c0_18] : memref<2x9x192xf32, #tpu.memory_space<vmem>>, vector<1x1x64xf32>
    %16 = vector.shape_cast %15 : vector<1x1x64xf32> to vector<1x64xf32>
    %c0_19 = arith.constant 0 : index
    %c3 = arith.constant 3 : index
    %c0_20 = arith.constant 0 : index
    %17 = vector.load %arg4[%c0_19, %c3, %c0_20] : memref<2x9x192xf32, #tpu.memory_space<vmem>>, vector<1x1x64xf32>
    %18 = vector.shape_cast %17 : vector<1x1x64xf32> to vector<1x64xf32>
    %c0_21 = arith.constant 0 : index
    %c4 = arith.constant 4 : index
    %c0_22 = arith.constant 0 : index
    %19 = vector.load %arg4[%c0_21, %c4, %c0_22] : memref<2x9x192xf32, #tpu.memory_space<vmem>>, vector<1x1x128xf32>
    %20 = vector.shape_cast %19 : vector<1x1x128xf32> to vector<1x128xf32>
    %c0_23 = arith.constant 0 : index
    %c5 = arith.constant 5 : index
    %c0_24 = arith.constant 0 : index
    %21 = vector.load %arg4[%c0_23, %c5, %c0_24] : memref<2x9x192xf32, #tpu.memory_space<vmem>>, vector<1x1x64xf32>
    %22 = vector.shape_cast %21 : vector<1x1x64xf32> to vector<1x64xf32>
    %c0_25 = arith.constant 0 : index
    %c6 = arith.constant 6 : index
    %c0_26 = arith.constant 0 : index
    %23 = vector.load %arg4[%c0_25, %c6, %c0_26] : memref<2x9x192xf32, #tpu.memory_space<vmem>>, vector<1x1x64xf32>
    %24 = vector.shape_cast %23 : vector<1x1x64xf32> to vector<1x64xf32>
    %c0_27 = arith.constant 0 : index
    %c7 = arith.constant 7 : index
    %c0_28 = arith.constant 0 : index
    %25 = vector.load %arg4[%c0_27, %c7, %c0_28] : memref<2x9x192xf32, #tpu.memory_space<vmem>>, vector<1x1x64xf32>
    %26 = vector.shape_cast %25 : vector<1x1x64xf32> to vector<1x64xf32>
    %27 = arith.truncf %2 : vector<16x64xf32> to vector<16x64xbf16>
    %cst = arith.constant dense<0.000000e+00> : vector<16x192xf32>
    %28 = tpu.matmul %27, %4, %cst {dimension_numbers = #tpu.dot_dimension_numbers<[1], [0], [0], [1], [0, 0, 1, 1], [], []>} : vector<16x64xbf16>, vector<64x192xbf16>, vector<16x192xf32> -> vector<16x192xf32>
    %29 = vector.broadcast %12 : vector<1x192xf32> to vector<16x192xf32>
    %30 = arith.addf %28, %29 : vector<16x192xf32>
    %31 = vector.shape_cast %30 : vector<16x192xf32> to vector<2x8x192xf32>
    %32 = arith.truncf %31 : vector<2x8x192xf32> to vector<2x8x192xbf16>
    %33 = vector.extract_strided_slice %32 {offsets = [0, 0, 0], sizes = [2, 8, 16], strides = [1, 1, 1]} : vector<2x8x192xbf16> to vector<2x8x16xbf16>
    %34 = vector.extract_strided_slice %32 {offsets = [0, 0, 16], sizes = [2, 8, 16], strides = [1, 1, 1]} : vector<2x8x192xbf16> to vector<2x8x16xbf16>
    %35 = vector.extract_strided_slice %32 {offsets = [0, 0, 32], sizes = [2, 8, 16], strides = [1, 1, 1]} : vector<2x8x192xbf16> to vector<2x8x16xbf16>
    %36 = vector.extract_strided_slice %32 {offsets = [0, 0, 48], sizes = [2, 8, 16], strides = [1, 1, 1]} : vector<2x8x192xbf16> to vector<2x8x16xbf16>
    %37 = tpu.concatenate %33, %34, %35, %36 in 0 : vector<2x8x16xbf16>, vector<2x8x16xbf16>, vector<2x8x16xbf16>, vector<2x8x16xbf16> -> vector<8x8x16xbf16>
    %38 = vector.extract_strided_slice %32 {offsets = [0, 0, 64], sizes = [2, 8, 16], strides = [1, 1, 1]} : vector<2x8x192xbf16> to vector<2x8x16xbf16>
    %39 = vector.extract_strided_slice %32 {offsets = [0, 0, 80], sizes = [2, 8, 16], strides = [1, 1, 1]} : vector<2x8x192xbf16> to vector<2x8x16xbf16>
    %40 = vector.extract_strided_slice %32 {offsets = [0, 0, 96], sizes = [2, 8, 16], strides = [1, 1, 1]} : vector<2x8x192xbf16> to vector<2x8x16xbf16>
    %41 = vector.extract_strided_slice %32 {offsets = [0, 0, 112], sizes = [2, 8, 16], strides = [1, 1, 1]} : vector<2x8x192xbf16> to vector<2x8x16xbf16>
    %42 = tpu.concatenate %38, %39, %40, %41 in 0 : vector<2x8x16xbf16>, vector<2x8x16xbf16>, vector<2x8x16xbf16>, vector<2x8x16xbf16> -> vector<8x8x16xbf16>
    %43 = vector.extract_strided_slice %32 {offsets = [0, 0, 128], sizes = [2, 8, 16], strides = [1, 1, 1]} : vector<2x8x192xbf16> to vector<2x8x16xbf16>
    %44 = vector.extract_strided_slice %32 {offsets = [0, 0, 144], sizes = [2, 8, 16], strides = [1, 1, 1]} : vector<2x8x192xbf16> to vector<2x8x16xbf16>
    %45 = vector.extract_strided_slice %32 {offsets = [0, 0, 160], sizes = [2, 8, 16], strides = [1, 1, 1]} : vector<2x8x192xbf16> to vector<2x8x16xbf16>
    %46 = vector.extract_strided_slice %32 {offsets = [0, 0, 176], sizes = [2, 8, 16], strides = [1, 1, 1]} : vector<2x8x192xbf16> to vector<2x8x16xbf16>
    %47 = tpu.concatenate %43, %44, %45, %46 in 0 : vector<2x8x16xbf16>, vector<2x8x16xbf16>, vector<2x8x16xbf16>, vector<2x8x16xbf16> -> vector<8x8x16xbf16>
    "tpu.trace_start"() <{level = 10 : i32, message = "bqd,bkd->bqk"}> : () -> ()
    %cst_29 = arith.constant dense<0.000000e+00> : vector<8x8x8xf32>
    %48 = tpu.matmul %37, %42, %cst_29 {dimension_numbers = #tpu.dot_dimension_numbers<[2], [2], [1], [1], [0, 0, 0, 1, 1, 1], [0], [0]>} : vector<8x8x16xbf16>, vector<8x8x16xbf16>, vector<8x8x8xf32> -> vector<8x8x8xf32>
    "tpu.trace_stop"() : () -> ()
    %cst_30 = arith.constant dense<0xFF800000> : vector<8x8xf32>
    %49 = vector.multi_reduction <maximumf>, %48, %cst_30 [2] : vector<8x8x8xf32> to vector<8x8xf32>
    %50 = vector.shape_cast %49 : vector<8x8xf32> to vector<8x8x1xf32>
    %51 = vector.broadcast %50 : vector<8x8x1xf32> to vector<8x8x8xf32>
    %52 = arith.subf %48, %51 : vector<8x8x8xf32>
    %53 = math.exp %52 : vector<8x8x8xf32>
    %cst_31 = arith.constant dense<0.000000e+00> : vector<8x8xf32>
    %54 = vector.multi_reduction <add>, %53, %cst_31 [2] : vector<8x8x8xf32> to vector<8x8xf32>
    %55 = vector.shape_cast %54 : vector<8x8xf32> to vector<8x8x1xf32>
    %56 = tpu.reciprocal %55 {approx = true} : vector<8x8x1xf32> -> vector<8x8x1xf32>
    %57 = vector.broadcast %56 : vector<8x8x1xf32> to vector<8x8x8xf32>
    %58 = arith.mulf %53, %57 : vector<8x8x8xf32>
    %59 = arith.truncf %58 : vector<8x8x8xf32> to vector<8x8x8xbf16>
    "tpu.trace_start"() <{level = 10 : i32, message = "bqk,bkd->bqd"}> : () -> ()
    %cst_32 = arith.constant dense<0.000000e+00> : vector<8x8x16xf32>
    %60 = tpu.matmul %59, %47, %cst_32 {dimension_numbers = #tpu.dot_dimension_numbers<[2], [1], [1], [2], [0, 0, 0, 1, 1, 2], [0], [0]>} : vector<8x8x8xbf16>, vector<8x8x16xbf16>, vector<8x8x16xf32> -> vector<8x8x16xf32>
    "tpu.trace_stop"() : () -> ()
    %61 = vector.shape_cast %14 : vector<1x64xf32> to vector<1x64xf32>
    %62 = vector.broadcast %61 : vector<1x64xf32> to vector<16x64xf32>
    %63 = vector.extract_strided_slice %60 {offsets = [0, 0, 0], sizes = [2, 8, 16], strides = [1, 1, 1]} : vector<8x8x16xf32> to vector<2x8x16xf32>
    %64 = vector.shape_cast %63 : vector<2x8x16xf32> to vector<16x16xf32>
    %65 = arith.truncf %64 : vector<16x16xf32> to vector<16x16xbf16>
    %66 = vector.extract_strided_slice %8 {offsets = [0, 0], sizes = [16, 64], strides = [1, 1]} : vector<64x64xbf16> to vector<16x64xbf16>
    %cst_33 = arith.constant dense<0.000000e+00> : vector<16x64xf32>
    %67 = tpu.matmul %65, %66, %cst_33 {dimension_numbers = #tpu.dot_dimension_numbers<[1], [0], [0], [1], [0, 0, 1, 1], [], []>} : vector<16x16xbf16>, vector<16x64xbf16>, vector<16x64xf32> -> vector<16x64xf32>
    %68 = arith.addf %62, %67 : vector<16x64xf32>
    %69 = vector.extract_strided_slice %60 {offsets = [2, 0, 0], sizes = [2, 8, 16], strides = [1, 1, 1]} : vector<8x8x16xf32> to vector<2x8x16xf32>
    %70 = vector.shape_cast %69 : vector<2x8x16xf32> to vector<16x16xf32>
    %71 = arith.truncf %70 : vector<16x16xf32> to vector<16x16xbf16>
    %72 = vector.extract_strided_slice %8 {offsets = [16, 0], sizes = [16, 64], strides = [1, 1]} : vector<64x64xbf16> to vector<16x64xbf16>
    %cst_34 = arith.constant dense<0.000000e+00> : vector<16x64xf32>
    %73 = tpu.matmul %71, %72, %cst_34 {dimension_numbers = #tpu.dot_dimension_numbers<[1], [0], [0], [1], [0, 0, 1, 1], [], []>} : vector<16x16xbf16>, vector<16x64xbf16>, vector<16x64xf32> -> vector<16x64xf32>
    %74 = arith.addf %68, %73 : vector<16x64xf32>
    %75 = vector.extract_strided_slice %60 {offsets = [4, 0, 0], sizes = [2, 8, 16], strides = [1, 1, 1]} : vector<8x8x16xf32> to vector<2x8x16xf32>
    %76 = vector.shape_cast %75 : vector<2x8x16xf32> to vector<16x16xf32>
    %77 = arith.truncf %76 : vector<16x16xf32> to vector<16x16xbf16>
    %78 = vector.extract_strided_slice %8 {offsets = [32, 0], sizes = [16, 64], strides = [1, 1]} : vector<64x64xbf16> to vector<16x64xbf16>
    %cst_35 = arith.constant dense<0.000000e+00> : vector<16x64xf32>
    %79 = tpu.matmul %77, %78, %cst_35 {dimension_numbers = #tpu.dot_dimension_numbers<[1], [0], [0], [1], [0, 0, 1, 1], [], []>} : vector<16x16xbf16>, vector<16x64xbf16>, vector<16x64xf32> -> vector<16x64xf32>
    %80 = arith.addf %74, %79 : vector<16x64xf32>
    %81 = vector.extract_strided_slice %60 {offsets = [6, 0, 0], sizes = [2, 8, 16], strides = [1, 1, 1]} : vector<8x8x16xf32> to vector<2x8x16xf32>
    %82 = vector.shape_cast %81 : vector<2x8x16xf32> to vector<16x16xf32>
    %83 = arith.truncf %82 : vector<16x16xf32> to vector<16x16xbf16>
    %84 = vector.extract_strided_slice %8 {offsets = [48, 0], sizes = [16, 64], strides = [1, 1]} : vector<64x64xbf16> to vector<16x64xbf16>
    %cst_36 = arith.constant dense<0.000000e+00> : vector<16x64xf32>
    %85 = tpu.matmul %83, %84, %cst_36 {dimension_numbers = #tpu.dot_dimension_numbers<[1], [0], [0], [1], [0, 0, 1, 1], [], []>} : vector<16x16xbf16>, vector<16x64xbf16>, vector<16x64xf32> -> vector<16x64xf32>
    %86 = arith.addf %80, %85 : vector<16x64xf32>
    %87 = arith.addf %2, %86 : vector<16x64xf32>
    %cst_37 = arith.constant dense<0.000000e+00> : vector<16xf32>
    %88 = vector.multi_reduction <add>, %87, %cst_37 [1] : vector<16x64xf32> to vector<16xf32>
    %89 = vector.shape_cast %88 : vector<16xf32> to vector<16x1xf32>
    %cst_38 = arith.constant 6.400000e+01 : f32
    %90 = vector.broadcast %cst_38 : f32 to vector<16x1xf32>
    %91 = arith.divf %89, %90 : vector<16x1xf32>
    %92 = vector.broadcast %91 : vector<16x1xf32> to vector<16x64xf32>
    %93 = arith.subf %87, %92 : vector<16x64xf32>
    %94 = arith.mulf %93, %93 : vector<16x64xf32>
    %cst_39 = arith.constant dense<0.000000e+00> : vector<16xf32>
    %95 = vector.multi_reduction <add>, %94, %cst_39 [1] : vector<16x64xf32> to vector<16xf32>
    %96 = vector.shape_cast %95 : vector<16xf32> to vector<16x1xf32>
    %cst_40 = arith.constant 6.400000e+01 : f32
    %97 = vector.broadcast %cst_40 : f32 to vector<16x1xf32>
    %98 = arith.divf %96, %97 : vector<16x1xf32>
    %99 = vector.broadcast %91 : vector<16x1xf32> to vector<16x64xf32>
    %100 = arith.subf %87, %99 : vector<16x64xf32>
    %cst_41 = arith.constant 9.99999974E-6 : f32
    %101 = vector.broadcast %cst_41 : f32 to vector<16x1xf32>
    %102 = arith.addf %98, %101 : vector<16x1xf32>
    %103 = math.rsqrt %102 : vector<16x1xf32>
    %104 = vector.broadcast %103 : vector<16x1xf32> to vector<16x64xf32>
    %105 = arith.mulf %100, %104 : vector<16x64xf32>
    %106 = vector.broadcast %16 : vector<1x64xf32> to vector<16x64xf32>
    %107 = arith.mulf %105, %106 : vector<16x64xf32>
    %108 = vector.broadcast %18 : vector<1x64xf32> to vector<16x64xf32>
    %109 = arith.addf %107, %108 : vector<16x64xf32>
    %110 = arith.truncf %109 : vector<16x64xf32> to vector<16x64xbf16>
    %cst_42 = arith.constant dense<0.000000e+00> : vector<16x128xf32>
    %111 = tpu.matmul %110, %6, %cst_42 {dimension_numbers = #tpu.dot_dimension_numbers<[1], [0], [0], [1], [0, 0, 1, 1], [], []>} : vector<16x64xbf16>, vector<64x128xbf16>, vector<16x128xf32> -> vector<16x128xf32>
    %112 = vector.broadcast %20 : vector<1x128xf32> to vector<16x128xf32>
    %113 = arith.addf %111, %112 : vector<16x128xf32>
    %cst_43 = arith.constant 0.000000e+00 : f32
    %114 = vector.broadcast %cst_43 : f32 to vector<16x128xf32>
    %115 = arith.maximumf %113, %114 : vector<16x128xf32>
    %116 = arith.truncf %115 : vector<16x128xf32> to vector<16x128xbf16>
    %cst_44 = arith.constant dense<0.000000e+00> : vector<16x64xf32>
    %117 = tpu.matmul %116, %10, %cst_44 {dimension_numbers = #tpu.dot_dimension_numbers<[1], [0], [0], [1], [0, 0, 1, 1], [], []>} : vector<16x128xbf16>, vector<128x64xbf16>, vector<16x64xf32> -> vector<16x64xf32>
    %118 = vector.broadcast %22 : vector<1x64xf32> to vector<16x64xf32>
    %119 = arith.addf %117, %118 : vector<16x64xf32>
    %120 = arith.addf %109, %119 : vector<16x64xf32>
    %cst_45 = arith.constant dense<0.000000e+00> : vector<16xf32>
    %121 = vector.multi_reduction <add>, %120, %cst_45 [1] : vector<16x64xf32> to vector<16xf32>
    %122 = vector.shape_cast %121 : vector<16xf32> to vector<16x1xf32>
    %cst_46 = arith.constant 6.400000e+01 : f32
    %123 = vector.broadcast %cst_46 : f32 to vector<16x1xf32>
    %124 = arith.divf %122, %123 : vector<16x1xf32>
    %125 = vector.broadcast %124 : vector<16x1xf32> to vector<16x64xf32>
    %126 = arith.subf %120, %125 : vector<16x64xf32>
    %127 = arith.mulf %126, %126 : vector<16x64xf32>
    %cst_47 = arith.constant dense<0.000000e+00> : vector<16xf32>
    %128 = vector.multi_reduction <add>, %127, %cst_47 [1] : vector<16x64xf32> to vector<16xf32>
    %129 = vector.shape_cast %128 : vector<16xf32> to vector<16x1xf32>
    %cst_48 = arith.constant 6.400000e+01 : f32
    %130 = vector.broadcast %cst_48 : f32 to vector<16x1xf32>
    %131 = arith.divf %129, %130 : vector<16x1xf32>
    %132 = vector.broadcast %124 : vector<16x1xf32> to vector<16x64xf32>
    %133 = arith.subf %120, %132 : vector<16x64xf32>
    %cst_49 = arith.constant 9.99999974E-6 : f32
    %134 = vector.broadcast %cst_49 : f32 to vector<16x1xf32>
    %135 = arith.addf %131, %134 : vector<16x1xf32>
    %136 = math.rsqrt %135 : vector<16x1xf32>
    %137 = vector.broadcast %136 : vector<16x1xf32> to vector<16x64xf32>
    %138 = arith.mulf %133, %137 : vector<16x64xf32>
    %139 = vector.broadcast %24 : vector<1x64xf32> to vector<16x64xf32>
    %140 = arith.mulf %138, %139 : vector<16x64xf32>
    %141 = vector.broadcast %26 : vector<1x64xf32> to vector<16x64xf32>
    %142 = arith.addf %140, %141 : vector<16x64xf32>
    %c1_50 = arith.constant 1 : index
    %c0_51 = arith.constant 0 : index
    %c0_52 = arith.constant 0 : index
    %143 = vector.load %arg2[%c1_50, %c0_51, %c0_52] : memref<2x64x640xbf16, #tpu.memory_space<vmem>>, vector<1x64x192xbf16>
    %144 = vector.shape_cast %143 : vector<1x64x192xbf16> to vector<64x192xbf16>
    %c1_53 = arith.constant 1 : index
    %c0_54 = arith.constant 0 : index
    %c256_55 = arith.constant 256 : index
    %145 = vector.load %arg2[%c1_53, %c0_54, %c256_55] : memref<2x64x640xbf16, #tpu.memory_space<vmem>>, vector<1x64x128xbf16>
    %146 = vector.shape_cast %145 : vector<1x64x128xbf16> to vector<64x128xbf16>
    %c1_56 = arith.constant 1 : index
    %c0_57 = arith.constant 0 : index
    %c384_58 = arith.constant 384 : index
    %147 = vector.load %arg2[%c1_56, %c0_57, %c384_58] : memref<2x64x640xbf16, #tpu.memory_space<vmem>>, vector<1x64x64xbf16>
    %148 = vector.shape_cast %147 : vector<1x64x64xbf16> to vector<64x64xbf16>
    %c1_59 = arith.constant 1 : index
    %c0_60 = arith.constant 0 : index
    %c0_61 = arith.constant 0 : index
    %149 = vector.load %arg3[%c1_59, %c0_60, %c0_61] : memref<2x128x64xbf16, #tpu.memory_space<vmem>>, vector<1x128x64xbf16>
    %150 = vector.shape_cast %149 : vector<1x128x64xbf16> to vector<128x64xbf16>
    %c1_62 = arith.constant 1 : index
    %c0_63 = arith.constant 0 : index
    %c0_64 = arith.constant 0 : index
    %151 = vector.load %arg4[%c1_62, %c0_63, %c0_64] : memref<2x9x192xf32, #tpu.memory_space<vmem>>, vector<1x1x192xf32>
    %152 = vector.shape_cast %151 : vector<1x1x192xf32> to vector<1x192xf32>
    %c1_65 = arith.constant 1 : index
    %c1_66 = arith.constant 1 : index
    %c0_67 = arith.constant 0 : index
    %153 = vector.load %arg4[%c1_65, %c1_66, %c0_67] : memref<2x9x192xf32, #tpu.memory_space<vmem>>, vector<1x1x64xf32>
    %154 = vector.shape_cast %153 : vector<1x1x64xf32> to vector<1x64xf32>
    %c1_68 = arith.constant 1 : index
    %c2_69 = arith.constant 2 : index
    %c0_70 = arith.constant 0 : index
    %155 = vector.load %arg4[%c1_68, %c2_69, %c0_70] : memref<2x9x192xf32, #tpu.memory_space<vmem>>, vector<1x1x64xf32>
    %156 = vector.shape_cast %155 : vector<1x1x64xf32> to vector<1x64xf32>
    %c1_71 = arith.constant 1 : index
    %c3_72 = arith.constant 3 : index
    %c0_73 = arith.constant 0 : index
    %157 = vector.load %arg4[%c1_71, %c3_72, %c0_73] : memref<2x9x192xf32, #tpu.memory_space<vmem>>, vector<1x1x64xf32>
    %158 = vector.shape_cast %157 : vector<1x1x64xf32> to vector<1x64xf32>
    %c1_74 = arith.constant 1 : index
    %c4_75 = arith.constant 4 : index
    %c0_76 = arith.constant 0 : index
    %159 = vector.load %arg4[%c1_74, %c4_75, %c0_76] : memref<2x9x192xf32, #tpu.memory_space<vmem>>, vector<1x1x128xf32>
    %160 = vector.shape_cast %159 : vector<1x1x128xf32> to vector<1x128xf32>
    %c1_77 = arith.constant 1 : index
    %c5_78 = arith.constant 5 : index
    %c0_79 = arith.constant 0 : index
    %161 = vector.load %arg4[%c1_77, %c5_78, %c0_79] : memref<2x9x192xf32, #tpu.memory_space<vmem>>, vector<1x1x64xf32>
    %162 = vector.shape_cast %161 : vector<1x1x64xf32> to vector<1x64xf32>
    %c1_80 = arith.constant 1 : index
    %c6_81 = arith.constant 6 : index
    %c0_82 = arith.constant 0 : index
    %163 = vector.load %arg4[%c1_80, %c6_81, %c0_82] : memref<2x9x192xf32, #tpu.memory_space<vmem>>, vector<1x1x64xf32>
    %164 = vector.shape_cast %163 : vector<1x1x64xf32> to vector<1x64xf32>
    %c1_83 = arith.constant 1 : index
    %c7_84 = arith.constant 7 : index
    %c0_85 = arith.constant 0 : index
    %165 = vector.load %arg4[%c1_83, %c7_84, %c0_85] : memref<2x9x192xf32, #tpu.memory_space<vmem>>, vector<1x1x64xf32>
    %166 = vector.shape_cast %165 : vector<1x1x64xf32> to vector<1x64xf32>
    %167 = arith.truncf %142 : vector<16x64xf32> to vector<16x64xbf16>
    %cst_86 = arith.constant dense<0.000000e+00> : vector<16x192xf32>
    %168 = tpu.matmul %167, %144, %cst_86 {dimension_numbers = #tpu.dot_dimension_numbers<[1], [0], [0], [1], [0, 0, 1, 1], [], []>} : vector<16x64xbf16>, vector<64x192xbf16>, vector<16x192xf32> -> vector<16x192xf32>
    %169 = vector.broadcast %152 : vector<1x192xf32> to vector<16x192xf32>
    %170 = arith.addf %168, %169 : vector<16x192xf32>
    %171 = vector.shape_cast %170 : vector<16x192xf32> to vector<2x8x192xf32>
    %172 = arith.truncf %171 : vector<2x8x192xf32> to vector<2x8x192xbf16>
    %173 = vector.extract_strided_slice %172 {offsets = [0, 0, 0], sizes = [2, 8, 16], strides = [1, 1, 1]} : vector<2x8x192xbf16> to vector<2x8x16xbf16>
    %174 = vector.extract_strided_slice %172 {offsets = [0, 0, 16], sizes = [2, 8, 16], strides = [1, 1, 1]} : vector<2x8x192xbf16> to vector<2x8x16xbf16>
    %175 = vector.extract_strided_slice %172 {offsets = [0, 0, 32], sizes = [2, 8, 16], strides = [1, 1, 1]} : vector<2x8x192xbf16> to vector<2x8x16xbf16>
    %176 = vector.extract_strided_slice %172 {offsets = [0, 0, 48], sizes = [2, 8, 16], strides = [1, 1, 1]} : vector<2x8x192xbf16> to vector<2x8x16xbf16>
    %177 = tpu.concatenate %173, %174, %175, %176 in 0 : vector<2x8x16xbf16>, vector<2x8x16xbf16>, vector<2x8x16xbf16>, vector<2x8x16xbf16> -> vector<8x8x16xbf16>
    %178 = vector.extract_strided_slice %172 {offsets = [0, 0, 64], sizes = [2, 8, 16], strides = [1, 1, 1]} : vector<2x8x192xbf16> to vector<2x8x16xbf16>
    %179 = vector.extract_strided_slice %172 {offsets = [0, 0, 80], sizes = [2, 8, 16], strides = [1, 1, 1]} : vector<2x8x192xbf16> to vector<2x8x16xbf16>
    %180 = vector.extract_strided_slice %172 {offsets = [0, 0, 96], sizes = [2, 8, 16], strides = [1, 1, 1]} : vector<2x8x192xbf16> to vector<2x8x16xbf16>
    %181 = vector.extract_strided_slice %172 {offsets = [0, 0, 112], sizes = [2, 8, 16], strides = [1, 1, 1]} : vector<2x8x192xbf16> to vector<2x8x16xbf16>
    %182 = tpu.concatenate %178, %179, %180, %181 in 0 : vector<2x8x16xbf16>, vector<2x8x16xbf16>, vector<2x8x16xbf16>, vector<2x8x16xbf16> -> vector<8x8x16xbf16>
    %183 = vector.extract_strided_slice %172 {offsets = [0, 0, 128], sizes = [2, 8, 16], strides = [1, 1, 1]} : vector<2x8x192xbf16> to vector<2x8x16xbf16>
    %184 = vector.extract_strided_slice %172 {offsets = [0, 0, 144], sizes = [2, 8, 16], strides = [1, 1, 1]} : vector<2x8x192xbf16> to vector<2x8x16xbf16>
    %185 = vector.extract_strided_slice %172 {offsets = [0, 0, 160], sizes = [2, 8, 16], strides = [1, 1, 1]} : vector<2x8x192xbf16> to vector<2x8x16xbf16>
    %186 = vector.extract_strided_slice %172 {offsets = [0, 0, 176], sizes = [2, 8, 16], strides = [1, 1, 1]} : vector<2x8x192xbf16> to vector<2x8x16xbf16>
    %187 = tpu.concatenate %183, %184, %185, %186 in 0 : vector<2x8x16xbf16>, vector<2x8x16xbf16>, vector<2x8x16xbf16>, vector<2x8x16xbf16> -> vector<8x8x16xbf16>
    "tpu.trace_start"() <{level = 10 : i32, message = "bqd,bkd->bqk"}> : () -> ()
    %cst_87 = arith.constant dense<0.000000e+00> : vector<8x8x8xf32>
    %188 = tpu.matmul %177, %182, %cst_87 {dimension_numbers = #tpu.dot_dimension_numbers<[2], [2], [1], [1], [0, 0, 0, 1, 1, 1], [0], [0]>} : vector<8x8x16xbf16>, vector<8x8x16xbf16>, vector<8x8x8xf32> -> vector<8x8x8xf32>
    "tpu.trace_stop"() : () -> ()
    %cst_88 = arith.constant dense<0xFF800000> : vector<8x8xf32>
    %189 = vector.multi_reduction <maximumf>, %188, %cst_88 [2] : vector<8x8x8xf32> to vector<8x8xf32>
    %190 = vector.shape_cast %189 : vector<8x8xf32> to vector<8x8x1xf32>
    %191 = vector.broadcast %190 : vector<8x8x1xf32> to vector<8x8x8xf32>
    %192 = arith.subf %188, %191 : vector<8x8x8xf32>
    %193 = math.exp %192 : vector<8x8x8xf32>
    %cst_89 = arith.constant dense<0.000000e+00> : vector<8x8xf32>
    %194 = vector.multi_reduction <add>, %193, %cst_89 [2] : vector<8x8x8xf32> to vector<8x8xf32>
    %195 = vector.shape_cast %194 : vector<8x8xf32> to vector<8x8x1xf32>
    %196 = tpu.reciprocal %195 {approx = true} : vector<8x8x1xf32> -> vector<8x8x1xf32>
    %197 = vector.broadcast %196 : vector<8x8x1xf32> to vector<8x8x8xf32>
    %198 = arith.mulf %193, %197 : vector<8x8x8xf32>
    %199 = arith.truncf %198 : vector<8x8x8xf32> to vector<8x8x8xbf16>
    "tpu.trace_start"() <{level = 10 : i32, message = "bqk,bkd->bqd"}> : () -> ()
    %cst_90 = arith.constant dense<0.000000e+00> : vector<8x8x16xf32>
    %200 = tpu.matmul %199, %187, %cst_90 {dimension_numbers = #tpu.dot_dimension_numbers<[2], [1], [1], [2], [0, 0, 0, 1, 1, 2], [0], [0]>} : vector<8x8x8xbf16>, vector<8x8x16xbf16>, vector<8x8x16xf32> -> vector<8x8x16xf32>
    "tpu.trace_stop"() : () -> ()
    %201 = vector.shape_cast %154 : vector<1x64xf32> to vector<1x64xf32>
    %202 = vector.broadcast %201 : vector<1x64xf32> to vector<16x64xf32>
    %203 = vector.extract_strided_slice %200 {offsets = [0, 0, 0], sizes = [2, 8, 16], strides = [1, 1, 1]} : vector<8x8x16xf32> to vector<2x8x16xf32>
    %204 = vector.shape_cast %203 : vector<2x8x16xf32> to vector<16x16xf32>
    %205 = arith.truncf %204 : vector<16x16xf32> to vector<16x16xbf16>
    %206 = vector.extract_strided_slice %148 {offsets = [0, 0], sizes = [16, 64], strides = [1, 1]} : vector<64x64xbf16> to vector<16x64xbf16>
    %cst_91 = arith.constant dense<0.000000e+00> : vector<16x64xf32>
    %207 = tpu.matmul %205, %206, %cst_91 {dimension_numbers = #tpu.dot_dimension_numbers<[1], [0], [0], [1], [0, 0, 1, 1], [], []>} : vector<16x16xbf16>, vector<16x64xbf16>, vector<16x64xf32> -> vector<16x64xf32>
    %208 = arith.addf %202, %207 : vector<16x64xf32>
    %209 = vector.extract_strided_slice %200 {offsets = [2, 0, 0], sizes = [2, 8, 16], strides = [1, 1, 1]} : vector<8x8x16xf32> to vector<2x8x16xf32>
    %210 = vector.shape_cast %209 : vector<2x8x16xf32> to vector<16x16xf32>
    %211 = arith.truncf %210 : vector<16x16xf32> to vector<16x16xbf16>
    %212 = vector.extract_strided_slice %148 {offsets = [16, 0], sizes = [16, 64], strides = [1, 1]} : vector<64x64xbf16> to vector<16x64xbf16>
    %cst_92 = arith.constant dense<0.000000e+00> : vector<16x64xf32>
    %213 = tpu.matmul %211, %212, %cst_92 {dimension_numbers = #tpu.dot_dimension_numbers<[1], [0], [0], [1], [0, 0, 1, 1], [], []>} : vector<16x16xbf16>, vector<16x64xbf16>, vector<16x64xf32> -> vector<16x64xf32>
    %214 = arith.addf %208, %213 : vector<16x64xf32>
    %215 = vector.extract_strided_slice %200 {offsets = [4, 0, 0], sizes = [2, 8, 16], strides = [1, 1, 1]} : vector<8x8x16xf32> to vector<2x8x16xf32>
    %216 = vector.shape_cast %215 : vector<2x8x16xf32> to vector<16x16xf32>
    %217 = arith.truncf %216 : vector<16x16xf32> to vector<16x16xbf16>
    %218 = vector.extract_strided_slice %148 {offsets = [32, 0], sizes = [16, 64], strides = [1, 1]} : vector<64x64xbf16> to vector<16x64xbf16>
    %cst_93 = arith.constant dense<0.000000e+00> : vector<16x64xf32>
    %219 = tpu.matmul %217, %218, %cst_93 {dimension_numbers = #tpu.dot_dimension_numbers<[1], [0], [0], [1], [0, 0, 1, 1], [], []>} : vector<16x16xbf16>, vector<16x64xbf16>, vector<16x64xf32> -> vector<16x64xf32>
    %220 = arith.addf %214, %219 : vector<16x64xf32>
    %221 = vector.extract_strided_slice %200 {offsets = [6, 0, 0], sizes = [2, 8, 16], strides = [1, 1, 1]} : vector<8x8x16xf32> to vector<2x8x16xf32>
    %222 = vector.shape_cast %221 : vector<2x8x16xf32> to vector<16x16xf32>
    %223 = arith.truncf %222 : vector<16x16xf32> to vector<16x16xbf16>
    %224 = vector.extract_strided_slice %148 {offsets = [48, 0], sizes = [16, 64], strides = [1, 1]} : vector<64x64xbf16> to vector<16x64xbf16>
    %cst_94 = arith.constant dense<0.000000e+00> : vector<16x64xf32>
    %225 = tpu.matmul %223, %224, %cst_94 {dimension_numbers = #tpu.dot_dimension_numbers<[1], [0], [0], [1], [0, 0, 1, 1], [], []>} : vector<16x16xbf16>, vector<16x64xbf16>, vector<16x64xf32> -> vector<16x64xf32>
    %226 = arith.addf %220, %225 : vector<16x64xf32>
    %227 = arith.addf %142, %226 : vector<16x64xf32>
    %cst_95 = arith.constant dense<0.000000e+00> : vector<16xf32>
    %228 = vector.multi_reduction <add>, %227, %cst_95 [1] : vector<16x64xf32> to vector<16xf32>
    %229 = vector.shape_cast %228 : vector<16xf32> to vector<16x1xf32>
    %cst_96 = arith.constant 6.400000e+01 : f32
    %230 = vector.broadcast %cst_96 : f32 to vector<16x1xf32>
    %231 = arith.divf %229, %230 : vector<16x1xf32>
    %232 = vector.broadcast %231 : vector<16x1xf32> to vector<16x64xf32>
    %233 = arith.subf %227, %232 : vector<16x64xf32>
    %234 = arith.mulf %233, %233 : vector<16x64xf32>
    %cst_97 = arith.constant dense<0.000000e+00> : vector<16xf32>
    %235 = vector.multi_reduction <add>, %234, %cst_97 [1] : vector<16x64xf32> to vector<16xf32>
    %236 = vector.shape_cast %235 : vector<16xf32> to vector<16x1xf32>
    %cst_98 = arith.constant 6.400000e+01 : f32
    %237 = vector.broadcast %cst_98 : f32 to vector<16x1xf32>
    %238 = arith.divf %236, %237 : vector<16x1xf32>
    %239 = vector.broadcast %231 : vector<16x1xf32> to vector<16x64xf32>
    %240 = arith.subf %227, %239 : vector<16x64xf32>
    %cst_99 = arith.constant 9.99999974E-6 : f32
    %241 = vector.broadcast %cst_99 : f32 to vector<16x1xf32>
    %242 = arith.addf %238, %241 : vector<16x1xf32>
    %243 = math.rsqrt %242 : vector<16x1xf32>
    %244 = vector.broadcast %243 : vector<16x1xf32> to vector<16x64xf32>
    %245 = arith.mulf %240, %244 : vector<16x64xf32>
    %246 = vector.broadcast %156 : vector<1x64xf32> to vector<16x64xf32>
    %247 = arith.mulf %245, %246 : vector<16x64xf32>
    %248 = vector.broadcast %158 : vector<1x64xf32> to vector<16x64xf32>
    %249 = arith.addf %247, %248 : vector<16x64xf32>
    %250 = arith.truncf %249 : vector<16x64xf32> to vector<16x64xbf16>
    %cst_100 = arith.constant dense<0.000000e+00> : vector<16x128xf32>
    %251 = tpu.matmul %250, %146, %cst_100 {dimension_numbers = #tpu.dot_dimension_numbers<[1], [0], [0], [1], [0, 0, 1, 1], [], []>} : vector<16x64xbf16>, vector<64x128xbf16>, vector<16x128xf32> -> vector<16x128xf32>
    %252 = vector.broadcast %160 : vector<1x128xf32> to vector<16x128xf32>
    %253 = arith.addf %251, %252 : vector<16x128xf32>
    %cst_101 = arith.constant 0.000000e+00 : f32
    %254 = vector.broadcast %cst_101 : f32 to vector<16x128xf32>
    %255 = arith.maximumf %253, %254 : vector<16x128xf32>
    %256 = arith.truncf %255 : vector<16x128xf32> to vector<16x128xbf16>
    %cst_102 = arith.constant dense<0.000000e+00> : vector<16x64xf32>
    %257 = tpu.matmul %256, %150, %cst_102 {dimension_numbers = #tpu.dot_dimension_numbers<[1], [0], [0], [1], [0, 0, 1, 1], [], []>} : vector<16x128xbf16>, vector<128x64xbf16>, vector<16x64xf32> -> vector<16x64xf32>
    %258 = vector.broadcast %162 : vector<1x64xf32> to vector<16x64xf32>
    %259 = arith.addf %257, %258 : vector<16x64xf32>
    %260 = arith.addf %249, %259 : vector<16x64xf32>
    %cst_103 = arith.constant dense<0.000000e+00> : vector<16xf32>
    %261 = vector.multi_reduction <add>, %260, %cst_103 [1] : vector<16x64xf32> to vector<16xf32>
    %262 = vector.shape_cast %261 : vector<16xf32> to vector<16x1xf32>
    %cst_104 = arith.constant 6.400000e+01 : f32
    %263 = vector.broadcast %cst_104 : f32 to vector<16x1xf32>
    %264 = arith.divf %262, %263 : vector<16x1xf32>
    %265 = vector.broadcast %264 : vector<16x1xf32> to vector<16x64xf32>
    %266 = arith.subf %260, %265 : vector<16x64xf32>
    %267 = arith.mulf %266, %266 : vector<16x64xf32>
    %cst_105 = arith.constant dense<0.000000e+00> : vector<16xf32>
    %268 = vector.multi_reduction <add>, %267, %cst_105 [1] : vector<16x64xf32> to vector<16xf32>
    %269 = vector.shape_cast %268 : vector<16xf32> to vector<16x1xf32>
    %cst_106 = arith.constant 6.400000e+01 : f32
    %270 = vector.broadcast %cst_106 : f32 to vector<16x1xf32>
    %271 = arith.divf %269, %270 : vector<16x1xf32>
    %272 = vector.broadcast %264 : vector<16x1xf32> to vector<16x64xf32>
    %273 = arith.subf %260, %272 : vector<16x64xf32>
    %cst_107 = arith.constant 9.99999974E-6 : f32
    %274 = vector.broadcast %cst_107 : f32 to vector<16x1xf32>
    %275 = arith.addf %271, %274 : vector<16x1xf32>
    %276 = math.rsqrt %275 : vector<16x1xf32>
    %277 = vector.broadcast %276 : vector<16x1xf32> to vector<16x64xf32>
    %278 = arith.mulf %273, %277 : vector<16x64xf32>
    %279 = vector.broadcast %164 : vector<1x64xf32> to vector<16x64xf32>
    %280 = arith.mulf %278, %279 : vector<16x64xf32>
    %281 = vector.broadcast %166 : vector<1x64xf32> to vector<16x64xf32>
    %282 = arith.addf %280, %281 : vector<16x64xf32>
    %283 = vector.shape_cast %282 : vector<16x64xf32> to vector<2x8x64xf32>
    %284 = vector.extract_strided_slice %283 {offsets = [0, 7, 0], sizes = [2, 1, 64], strides = [1, 1, 1]} : vector<2x8x64xf32> to vector<2x1x64xf32>
    %285 = vector.shape_cast %284 : vector<2x1x64xf32> to vector<2x64xf32>
    %c0_108 = arith.constant 0 : index
    %c0_109 = arith.constant 0 : index
    %c512 = arith.constant 512 : index
    %286 = vector.load %arg2[%c0_108, %c0_109, %c512] : memref<2x64x640xbf16, #tpu.memory_space<vmem>>, vector<1x64x128xbf16>
    %287 = vector.shape_cast %286 : vector<1x64x128xbf16> to vector<64x128xbf16>
    %c0_110 = arith.constant 0 : index
    %c8 = arith.constant 8 : index
    %c0_111 = arith.constant 0 : index
    %288 = vector.load %arg4[%c0_110, %c8, %c0_111] : memref<2x9x192xf32, #tpu.memory_space<vmem>>, vector<1x1x128xf32>
    %289 = vector.shape_cast %288 : vector<1x1x128xf32> to vector<1x128xf32>
    %290 = arith.truncf %285 : vector<2x64xf32> to vector<2x64xbf16>
    %cst_112 = arith.constant dense<0.000000e+00> : vector<2x128xf32>
    %291 = tpu.matmul %290, %287, %cst_112 {dimension_numbers = #tpu.dot_dimension_numbers<[1], [0], [0], [1], [0, 0, 1, 1], [], []>} : vector<2x64xbf16>, vector<64x128xbf16>, vector<2x128xf32> -> vector<2x128xf32>
    %292 = vector.broadcast %289 : vector<1x128xf32> to vector<2x128xf32>
    %293 = arith.addf %291, %292 : vector<2x128xf32>
    %c0_113 = arith.constant 0 : index
    %c0_114 = arith.constant 0 : index
    %294 = vector.load %arg5[%c0_113, %c0_114] : memref<2x128xf32, #tpu.memory_space<vmem>>, vector<2x128xf32>
    tpu.vector_store %arg5[%c0_113, %c0_114], %293 {strides = array<i32>} : memref<2x128xf32, #tpu.memory_space<vmem>>, vector<2x128xf32>,
    return
  }
  func.func @transform_0(%arg0: i32) -> (i32, i32, i32) {
    %c0_i32 = arith.constant 0 : i32
    %c0_i32_0 = arith.constant 0 : i32
    %c0_i32_1 = arith.constant 0 : i32
    return %arg0, %c0_i32, %c0_i32_0 : i32, i32, i32
  }
  func.func @transform_1(%arg0: i32) -> (i32, i32, i32) {
    %c0_i32 = arith.constant 0 : i32
    %c0_i32_0 = arith.constant 0 : i32
    %c0_i32_1 = arith.constant 0 : i32
    %c0_i32_2 = arith.constant 0 : i32
    return %c0_i32, %c0_i32_0, %c0_i32_1 : i32, i32, i32
  }
  func.func @transform_2(%arg0: i32) -> (i32, i32, i32) {
    %c0_i32 = arith.constant 0 : i32
    %c0_i32_0 = arith.constant 0 : i32
    %c0_i32_1 = arith.constant 0 : i32
    %c0_i32_2 = arith.constant 0 : i32
    return %c0_i32, %c0_i32_0, %c0_i32_1 : i32, i32, i32
  }
  func.func @transform_3(%arg0: i32) -> (i32, i32, i32) {
    %c0_i32 = arith.constant 0 : i32
    %c0_i32_0 = arith.constant 0 : i32
    %c0_i32_1 = arith.constant 0 : i32
    %c0_i32_2 = arith.constant 0 : i32
    return %c0_i32, %c0_i32_0, %c0_i32_1 : i32, i32, i32
  }
  func.func @transform_4(%arg0: i32) -> (i32, i32) {
    %c0_i32 = arith.constant 0 : i32
    %c0_i32_0 = arith.constant 0 : i32
    return %arg0, %c0_i32 : i32, i32
  }
}

</mosaic_0001>

<bundles_post_ra>
// kernel: parity_transformer_forward.1
= control target key start
LH: loop header
LB: loop body
LE: loop exit
PB: predicated region body
PF: predicated region fallthrough
CT: control target
= control target key end

     0   :  { %v3808_v2 = vmov 0   ;;  %vm123_vm0 = vcmask 523264   ;;  %s4499_s0 = inlined_call_operand.vmem [shape: bf16[2,8,64], index: 0, kind: input, shape index: {}]   ;;  %s4500_s1 = inlined_call_operand.vmem [shape: bf16[2,64,640], index: 1, kind: input, shape index: {}]   ;;  %s4501_s2 = inlined_call_operand.vmem [shape: bf16[2,128,64], index: 2, kind: input, shape index: {}]   ;;  %s4502_s3 = inlined_call_operand.vmem [shape: f32[2,9,192], index: 3, kind: input, shape index: {}]   ;;  %s4503_s4 = inlined_call_operand.hbm [shape: f32[2,128], index: 4, kind: output, shape index: {}]  }
   0x1   :  { %v3642_v0 = vld [vmem:[%s4500_s1 + $0x4] ss:$20 sps:$4 sm:$0xff]   ;;  %v3644_v1 = vld [vmem:[%s4500_s1] ss:$20 sps:$4 sm:$0xff]   ;;  %159 = vmatprep.mubr.bf16.mxu0 %v3808_v2  ;;  %v3647_v4 = vld [vmem:[%s4500_s1 + $0x28] ss:$20 sps:$4 sm:$0xff]  }
   0x2   :  { %127 = vmatprep.subr.bf16.mxu0 %v3642_v0  ;;  %v3645_v3 = vld [vmem:[%s4500_s1 + $0x2c] ss:$20 sps:$4 sm:$0xff]   ;;  %v3648_v5 = vld [vmem:[%s4500_s1 + $0x54] ss:$20 sps:$4 sm:$0xff]   ;;  %v3650_v6 = vld [vmem:[%s4500_s1 + $0x50] ss:$20 sps:$4 sm:$0xff]  }
   0x3   :  { %128 = vmatpush1.bf16.msra.mxu0 %v3644_v1  ;;  %v3651_v7 = vld [vmem:[%s4500_s1 + $0x7c] ss:$20 sps:$4 sm:$0xff]   ;;  %v3653_v8 = vld [vmem:[%s4500_s1 + $0x78] ss:$20 sps:$4 sm:$0xff]   ;;  %v3869_v9 = vld [vmem:[%s4499_s0] sm:$0xff]  }
   0x4   :  { %129 = vmatprep.subr.bf16.mxu0 %v3645_v3 }
   0x7   :  { %130 = vmatpush1.bf16.msra.mxu0 %v3647_v4 }
   0x8   :  { %131 = vmatprep.subr.bf16.mxu0 %v3648_v5 }
   0xb   :  { %132 = vmatpush1.bf16.msra.mxu0 %v3650_v6 }
   0xc   :  { %133 = vmatprep.subr.bf16.mxu0 %v3651_v7 }
   0xf   :  { %134 = vmatpush1.bf16.msra.mxu0 %v3653_v8 }
  0x12   :  { %3068 = vmatmul.mubr.msk.bf16.vlgmr.msra.gmra.mrb[0].mxu0 %vm123_vm0, %v3869_v9 }
  0x13   :  { %9 = vsyncpa [#allocation3], 0  ;;  %v73_v10 = vlaneseq  ;;  %v3879_v13 = vld [vmem:[%s4502_s3] ss:$8 sm:$0x3]  ;;  %v3809_v22 = vmov 0.0  }
  0x14   :  { %3318 = vmatprep.subr.bf16.mxu1 %v3809_v22  ;;  %3330 = vmatprep.subr.bf16.mxu0 %v3809_v22  ;;  %s3810_s0 = smov 96   ;;  %s3811_s9 = smov 112   ;;  %vm3812_vm1 = vmmov 0   ;;  %vm204_vm2 = vcmask 130048   ;;  %vm687_vm3 = vcmask 1043456   ;;  %vm587_vm4 = vcmask 64512  }
  0x15   :  { %v3873_v11 = vshrl.u32 %v73_v10, 7  ;;  %3320 = vmatprep.mubr.msk.bf16.mxu1 %vm3812_vm1, %v3809_v22  ;;  %3332 = vmatprep.mubr.msk.bf16.mxu0 %vm3812_vm1, %v3809_v22  ;;  %s3813_s10 = smov 80   ;;  %s3814_s11 = smov 64   ;;  %vm2974_vm5 = vcmask 1041409  }
  0x17   :  { %v75_v12 = vsub.s32 0, %v3873_v11  ;;  %v79_v39 = vsub.s32 1, %v3873_v11 }
  0x19   :  { %v76_v14 = vrot.slane %v3879_v13, %v75_v12  ;;  %v80_v42 = vrot.slane %v3879_v13, %v79_v39 }
  0xe5   :  { %v161_v15 = vpop.f32.mrb[0].mxu0 }
  0xe6   :  { %v162_v16 = vadd.f32 %v161_v15, %v76_v14  ;;  %v3884_v17 = vpop.f32.mrb[1].mxu0 }
  0xe7   :  { %v165_v18 = vpop.f32.mrb[2].mxu0  ;;  %v164_v45 = vadd.f32 %v3884_v17, %v80_v42 }
  0xe8   :  { %v170_v19 = vpack.c.bf16 %v162_v16, %v162_v16  ;;  %v166_v20 = vadd.f32 %v165_v18, %v76_v14  ;;  %v3886_v21 = vpop.f32.mrb[3].mxu0 }
  0xe9   :  { %v3942_v48 = vpack.c.bf16 %v164_v45, %v164_v45  ;;  %v168_v49 = vadd.f32 %v3886_v21, %v80_v42 }
  0xea   :  { %180 = vrot.lane.b32.xlu1 %v170_v19, %s3810_s0  ;;  %176 = vrot.lane.b32.xlu0 %v170_v19, %s3811_s9  ;;  %v172_v23 = vpack.c.bf16 %v166_v20, %v166_v20 }
  0xeb   :  { %v3950_v51 = vpack.c.bf16 %v168_v49, %v168_v49  ;;  %v689_v52 = vsel %vm687_vm3, %v3942_v48, 0 }
  0xed   :  { %v735_v53 = vsel %vm687_vm3, %v3950_v51, 0 }
  0xee   :  { %182 = vrot.lane.b32.xlu1 %v172_v23, %s3810_s0  ;;  %178 = vrot.lane.b32.xlu0 %v172_v23, %s3811_s9 }
  0xf2   :  { %186 = vrot.lane.b32.xlu1 %v172_v23, %s3813_s10  ;;  %184 = vrot.lane.b32.xlu0 %v170_v19, %s3813_s10 }
  0xf6   :  { %251 = vrot.lane.b32.xlu1 %v172_v23, %s3814_s11  ;;  %202 = vrot.lane.b32.xlu0 %v170_v19, %s3814_s11 }
 0x15c   :  { %v181_v24 = vpop.permute.xlu1 %180  ;;  %v177_v25 = vpop.permute.xlu0 %176 }
 0x15d   :  { %299 = vrot.lane.b32.xlu0 %v177_v25, %s3814_s11 }
 0x160   :  { %v179_v26 = vpop.permute.xlu0 %178  ;;  %v183_v27 = vpop.permute.xlu1 %182 }
 0x161   :  { %395 = vrot.lane.b32.xlu0 %v181_v24, %s3814_s11  ;;  %347 = vrot.lane.b32.xlu1 %v179_v26, %s3814_s11 }
 0x164   :  { %v185_v28 = vpop.permute.xlu0 %184  ;;  %v187_v29 = vpop.permute.xlu1 %186 }
 0x165   :  { %443 = vrot.lane.b32.xlu1 %v183_v27, %s3814_s11  ;;  %491 = vrot.lane.b32.xlu0 %v185_v28, %s3814_s11 }
 0x168   :  { %v203_v30 = vpop.permute.xlu0 %202  ;;  %v252_v32 = vpop.permute.xlu1 %251 }
 0x169   :  { %539 = vrot.lane.b32.xlu1 %v187_v29, %s3814_s11  ;;  %v209_v31 = vsel %vm204_vm2, %v203_v30, 0  ;;  %v257_v33 = vsel %vm204_vm2, %v252_v32, 0 }
 0x16a   :  { %3319 = vmatpush3.bf16.xpose.msra.mxu1 %v209_v31 }
 0x16b   :  { %3324 = vmatprep.subr.bf16.mxu1 %v3809_v22 }
 0x171   :  { %3321 = vmatmul.mubr.msk.bf16.vlgmr.msra.gmra.mrb[0].mxu1 %vm204_vm2, %v170_v19 }
 0x172   :  { %3325 = vmatpush3.bf16.xpose.msra.mxu1 %v257_v33  ;;  %3326 = vmatprep.mubr.msk.bf16.mxu1 %vm3812_vm1, %v3809_v22 }
 0x173   :  { %3336 = vmatprep.subr.bf16.mxu1 %v3809_v22 }
 0x179   :  { %3327 = vmatmul.mubr.msk.bf16.vlgmr.msra.gmra.mrb[4].mxu1 %vm204_vm2, %v172_v23 }
 0x17a   :  { %3338 = vmatprep.mubr.msk.bf16.mxu1 %vm3812_vm1, %v3809_v22 }
 0x1cf   :  { %v300_v34 = vpop.permute.xlu0 %299 }
 0x1d0   :  { %v305_v35 = vsel %vm204_vm2, %v300_v34, 0 }
 0x1d1   :  { %3331 = vmatpush3.bf16.xpose.msra.mxu0 %v305_v35 }
 0x1d2   :  { %3342 = vmatprep.subr.bf16.mxu0 %v3809_v22 }
 0x1d3   :  { %v348_v36 = vpop.permute.xlu1 %347  ;;  %v396_v38 = vpop.permute.xlu0 %395 }
 0x1d4   :  { %v353_v37 = vsel %vm204_vm2, %v348_v36, 0  ;;  %v401_v40 = vsel %vm204_vm2, %v396_v38, 0 }
 0x1d5   :  { %3337 = vmatpush3.bf16.xpose.msra.mxu1 %v353_v37 }
 0x1d6   :  { %3348 = vmatprep.subr.bf16.mxu1 %v3809_v22 }
 0x1d7   :  { %v444_v41 = vpop.permute.xlu1 %443  ;;  %v492_v44 = vpop.permute.xlu0 %491 }
 0x1d8   :  { %3333 = vmatmul.mubr.msk.bf16.vlgmr.msra.gmra.mrb[4].mxu0 %vm204_vm2, %v177_v25  ;;  %v449_v43 = vsel %vm204_vm2, %v444_v41, 0  ;;  %v497_v46 = vsel %vm204_vm2, %v492_v44, 0 }
 0x1d9   :  { %3343 = vmatpush3.bf16.xpose.msra.mxu0 %v401_v40  ;;  %3344 = vmatprep.mubr.msk.bf16.mxu0 %vm3812_vm1, %v3809_v22 }
 0x1da   :  { %3354 = vmatprep.subr.bf16.mxu0 %v3809_v22 }
 0x1db   :  { %v540_v47 = vpop.permute.xlu1 %539 }
 0x1dc   :  { %3339 = vmatmul.mubr.msk.bf16.vlgmr.msra.gmra.mrb[8].mxu1 %vm204_vm2, %v179_v26  ;;  %v545_v50 = vsel %vm204_vm2, %v540_v47, 0 }
 0x1dd   :  { %3349 = vmatpush3.bf16.xpose.msra.mxu1 %v449_v43  ;;  %3350 = vmatprep.mubr.msk.bf16.mxu1 %vm3812_vm1, %v3809_v22 }
 0x1de   :  { %3360 = vmatprep.subr.bf16.mxu1 %v3809_v22 }
 0x1e0   :  { %3345 = vmatmul.mubr.msk.bf16.vlgmr.msra.gmra.mrb[8].mxu0 %vm204_vm2, %v181_v24 }
 0x1e1   :  { %3355 = vmatpush3.bf16.xpose.msra.mxu0 %v497_v46  ;;  %3356 = vmatprep.mubr.msk.bf16.mxu0 %vm3812_vm1, %v3809_v22 }
 0x1e2   :  { %3366 = vmatprep.subr.bf16.mxu0 %v3809_v22 }
 0x1e4   :  { %3351 = vmatmul.mubr.msk.bf16.vlgmr.msra.gmra.mrb[12].mxu1 %vm204_vm2, %v183_v27 }
 0x1e5   :  { %3361 = vmatpush3.bf16.xpose.msra.mxu1 %v545_v50  ;;  %3362 = vmatprep.mubr.msk.bf16.mxu1 %vm3812_vm1, %v3809_v22 }
 0x1e6   :  { %3372 = vmatprep.subr.bf16.mxu1 %v3809_v22 }
 0x1e8   :  { %3357 = vmatmul.mubr.msk.bf16.vlgmr.msra.gmra.mrb[12].mxu0 %vm204_vm2, %v185_v28 }
 0x1e9   :  { %3367 = vmatpush3.bf16.msra.mxu0 %v689_v52  ;;  %3368 = vmatprep.mubr.msk.bf16.mxu0 %vm3812_vm1, %v3809_v22 }
 0x1ea   :  { %3378 = vmatprep.subr.bf16.mxu0 %v3809_v22 }
 0x1ec   :  { %3363 = vmatmul.mubr.msk.bf16.vlgmr.msra.gmra.mrb[16].mxu1 %vm204_vm2, %v187_v29 }
 0x1ed   :  { %3373 = vmatpush3.bf16.msra.mxu1 %v735_v53  ;;  %3374 = vmatprep.mubr.msk.bf16.mxu1 %vm3812_vm1, %v3809_v22 }
 0x1ee   :  { %3384 = vmatprep.subr.bf16.mxu1 %v3809_v22 }
 0x244   :  { %v245_v54 = vpop.f32.mrb[0].mxu1 }
 0x245   :  { %v3322_v55 = vpop.f32.mrb[1].mxu1  ;;  %v588_v56 = vsel %vm587_vm4, %v245_v54, -inf }
 0x246   :  { %589 = vmax.xlane.f32.xlu0 %v588_v56  ;;  %v248_v57 = vpop.f32.mrb[2].mxu1 }
 0x247   :  { %v3323_v58 = vpop.f32.mrb[3].mxu1 }
 0x24c   :  { %v293_v59 = vpop.f32.mrb[4].mxu1 }
 0x24d   :  { %v3328_v60 = vpop.f32.mrb[5].mxu1  ;;  %v591_v61 = vsel %vm587_vm4, %v293_v59, -inf }
 0x24e   :  { %592 = vmax.xlane.f32.xlu1 %v591_v61  ;;  %v296_v62 = vpop.f32.mrb[6].mxu1 }
 0x24f   :  { %v3329_v63 = vpop.f32.mrb[7].mxu1 }
 0x2ab   :  { %v341_v0 = vpop.f32.mrb[4].mxu0 }
 0x2ac   :  { %v3334_v1 = vpop.f32.mrb[5].mxu0  ;;  %v594_v3 = vsel %vm587_vm4, %v341_v0, -inf }
 0x2ad   :  { %595 = vmax.xlane.f32.xlu0 %v594_v3  ;;  %v344_v4 = vpop.f32.mrb[6].mxu0 }
 0x2ae   :  { %v3335_v5 = vpop.f32.mrb[7].mxu0 }
 0x2af   :  { %v389_v6 = vpop.f32.mrb[8].mxu1 }
 0x2b0   :  { %v3340_v7 = vpop.f32.mrb[9].mxu1  ;;  %v597_v8 = vsel %vm587_vm4, %v389_v6, -inf }
 0x2b1   :  { %v392_v10 = vpop.f32.mrb[10].mxu1  ;;  %598 = vmax.xlane.f32.xlu0 %v597_v8 }
 0x2b2   :  { %v3341_v13 = vpop.f32.mrb[11].mxu1 }
 0x2b3   :  { %v3968_v14 = vpop.f32.mrb[8].mxu0 }
 0x2b4   :  { %v3346_v15 = vpop.f32.mrb[9].mxu0  ;;  %v600_v16 = vsel %vm587_vm4, %v3968_v14, -inf }
 0x2b5   :  { %601 = vmax.xlane.f32.xlu1 %v600_v16  ;;  %v440_v17 = vpop.f32.mrb[10].mxu0 }
 0x2b6   :  { %v3347_v18 = vpop.f32.mrb[11].mxu0 }
 0x2b7   :  { %v485_v19 = vpop.f32.mrb[12].mxu1 }
 0x2b8   :  { %v3352_v20 = vpop.f32.mrb[13].mxu1  ;;  %v603_v21 = vsel %vm587_vm4, %v485_v19, -inf }
 0x2b9   :  { %v488_v23 = vpop.f32.mrb[14].mxu1  ;;  %604 = vmax.xlane.f32.xlu0 %v603_v21 }
 0x2ba   :  { %v3353_v24 = vpop.f32.mrb[15].mxu1 }
 0x2bb   :  { %v533_v25 = vpop.f32.mrb[12].mxu0 }
 0x2bc   :  { %v3358_v26 = vpop.f32.mrb[13].mxu0  ;;  %v606_v27 = vsel %vm587_vm4, %v533_v25, -inf }
 0x2bd   :  { %607 = vmax.xlane.f32.xlu1 %v606_v27  ;;  %v536_v28 = vpop.f32.mrb[14].mxu0 }
 0x2be   :  { %v3359_v29 = vpop.f32.mrb[15].mxu0 }
 0x2bf   :  { %v581_v30 = vpop.f32.mrb[16].mxu1 }
 0x2c0   :  { %v3364_v31 = vpop.f32.mrb[17].mxu1  ;;  %v609_v32 = vsel %vm587_vm4, %v581_v30, -inf }
 0x2c1   :  { %v584_v33 = vpop.f32.mrb[18].mxu1  ;;  %610 = vmax.xlane.f32.xlu0 %v609_v32 }
 0x2c2   :  { %v3365_v34 = vpop.f32.mrb[19].mxu1 }
 0x2ce   :  { %190 = vrot.lane.b32.xlu1 %v3942_v48, %s3811_s9 }
 0x2d3   :  { %v590_v35 = vpop.xlane.xlu0 %589 }
 0x2d4   :  { %v612_v37 = vsub.f32 %v245_v54, %v590_v35 }
 0x2d6   :  { %v620_v41 = vmul.f32 1.442695, %v612_v37 }
 0x2db   :  { %v593_v36 = vpop.xlane.xlu1 %592 }
 0x2dc   :  { %v613_v38 = vsub.f32 %v293_v59, %v593_v36 }
 0x2de   :  { %v622_v40 = vmul.f32 1.442695, %v613_v38 }
 0x2e0   :  { %3704 = vpow2.f32 %v622_v40 }
 0x2e1   :  { %3706 = vpow2.f32 %v620_v41 }
 0x2ea   :  { %v3705_v42 = vpop.eup %3704 }
 0x2eb   :  { %v639_v43 = vsel %vm587_vm4, %v3705_v42, 0.0  ;;  %v3707_v44 = vpop.eup %3706 }
 0x2ec   :  { %640 = vadd.xlane.f32.xlu0 %v639_v43  ;;  %v636_v45 = vsel %vm587_vm4, %v3707_v44, 0.0 }
 0x2f2   :  { %637 = vadd.xlane.f32.xlu1 %v636_v45 }
 0x33a   :  { %v596_v46 = vpop.xlane.xlu0 %595 }
 0x33b   :  { %v614_v47 = vsub.f32 %v341_v0, %v596_v46 }
 0x33d   :  { %v624_v49 = vmul.f32 1.442695, %v614_v47 }
 0x33e   :  { %v599_v50 = vpop.xlane.xlu0 %598 }
 0x33f   :  { %3708 = vpow2.f32 %v624_v49  ;;  %v615_v52 = vsub.f32 %v389_v6, %v599_v50 }
 0x341   :  { %v626_v53 = vmul.f32 1.442695, %v615_v52 }
 0x342   :  { %v602_v58 = vpop.xlane.xlu1 %601 }
 0x343   :  { %3710 = vpow2.f32 %v626_v53  ;;  %v616_v60 = vsub.f32 %v3968_v14, %v602_v58 }
 0x345   :  { %v628_v1 = vmul.f32 1.442695, %v616_v60 }
 0x346   :  { %v605_v59 = vpop.xlane.xlu0 %604 }
 0x347   :  { %v617_v62 = vsub.f32 %v485_v19, %v605_v59  ;;  %3712 = vpow2.f32 %v628_v1  ;;  %v3656_v1 = vld [vmem:[%s4500_s1 + $0x34] ss:$20 sps:$4 sm:$0xff]  }
 0x349   :  { %v3979_v54 = vpop.eup %3708  ;;  %v630_v4 = vmul.f32 1.442695, %v617_v62  ;;  %v3655_v62 = vld [vmem:[%s4500_s1 + $0xc] ss:$20 sps:$4 sm:$0xff]  }
 0x34a   :  { %v642_v55 = vsel %vm587_vm4, %v3979_v54, 0.0  ;;  %v608_v61 = vpop.xlane.xlu1 %607 }
 0x34b   :  { %643 = vadd.xlane.f32.xlu1 %v642_v55  ;;  %v618_v0 = vsub.f32 %v533_v25, %v608_v61  ;;  %3714 = vpow2.f32 %v630_v4 }
 0x34d   :  { %v3983_v56 = vpop.eup %3710  ;;  %v632_v5 = vmul.f32 1.442695, %v618_v0 }
 0x34e   :  { %v645_v57 = vsel %vm587_vm4, %v3983_v56, 0.0  ;;  %v611_v63 = vpop.xlane.xlu0 %610  ;;  %v191_v8 = vpop.permute.xlu1 %190 }
 0x34f   :  { %646 = vadd.xlane.f32.xlu0 %v645_v57  ;;  %v619_v3 = vsub.f32 %v581_v30, %v611_v63  ;;  %3716 = vpow2.f32 %v632_v5  ;;  %v781_v28 = vsel %vm687_vm3, %v191_v8, 0 }
 0x351   :  { %v634_v6 = vmul.f32 1.442695, %v619_v3  ;;  %v3994_v10 = vpop.eup %3712 }
 0x352   :  { %v648_v17 = vsel %vm587_vm4, %v3994_v10, 0.0 }
 0x353   :  { %3718 = vpow2.f32 %v634_v6 }
 0x355   :  { %v3996_v14 = vpop.eup %3714 }
 0x356   :  { %v651_v18 = vsel %vm587_vm4, %v3996_v14, 0.0 }
 0x359   :  { %v3998_v15 = vpop.eup %3716 }
 0x35a   :  { %v654_v21 = vsel %vm587_vm4, %v3998_v15, 0.0 }
 0x35c   :  { %194 = vrot.lane.b32.xlu1 %v3942_v48, %s3810_s0 }
 0x35d   :  { %v4000_v16 = vpop.eup %3718 }
 0x35e   :  { %v657_v23 = vsel %vm587_vm4, %v4000_v16, 0.0 }
 0x360   :  { %196 = vrot.lane.b32.xlu1 %v3950_v51, %s3810_s0 }
 0x365   :  { %192 = vrot.lane.b32.xlu0 %v3950_v51, %s3811_s9 }
 0x379   :  { %v641_v7 = vpop.xlane.xlu0 %640 }
 0x37a   :  { %3720 = vrcp.f32 %v641_v7 }
 0x37f   :  { %v638_v13 = vpop.xlane.xlu1 %637 }
 0x380   :  { %3722 = vrcp.f32 %v638_v13 }
 0x384   :  { %v3721_v19 = vpop.eup %3720  ;;  %649 = vadd.xlane.f32.xlu1 %v648_v17  ;;  %652 = vadd.xlane.f32.xlu0 %v651_v18 }
 0x385   :  { %v669_v20 = vmul.f32 %v3721_v19, %v3705_v42 }
 0x387   :  { %v677_v24 = vpack.c.bf16 %v669_v20, %v669_v20 }
 0x388   :  { %655 = vadd.xlane.f32.xlu1 %v654_v21  ;;  %658 = vadd.xlane.f32.xlu0 %v657_v23  ;;  %v3658_v21 = vld [vmem:[%s4500_s1 + $0x84] ss:$20 sps:$4 sm:$0xff]  }
 0x389   :  { %3375 = vmatmul.mubr.msk.bf16.vlgmr.msra.gmra.mrb[20].mxu1 %vm587_vm4, %v677_v24 }
 0x38a   :  { %v3723_v25 = vpop.eup %3722  ;;  %3386 = vmatprep.mubr.msk.bf16.mxu1 %vm3812_vm1, %v3809_v22 }
 0x38b   :  { %v668_v26 = vmul.f32 %v3723_v25, %v3707_v44 }
 0x38d   :  { %v676_v27 = vpack.c.bf16 %v668_v26, %v668_v26 }
 0x38f   :  { %3369 = vmatmul.mubr.msk.bf16.vlgmr.msra.gmra.mrb[16].mxu0 %vm587_vm4, %v676_v27 }
 0x390   :  { %3379 = vmatpush3.bf16.msra.mxu0 %v781_v28  ;;  %3380 = vmatprep.mubr.msk.bf16.mxu0 %vm3812_vm1, %v3809_v22 }
 0x391   :  { %3390 = vmatprep.subr.bf16.mxu0 %v3809_v22 }
 0x399   :  { %200 = vrot.lane.b32.xlu1 %v3950_v51, %s3813_s10 }
 0x39e   :  { %198 = vrot.lane.b32.xlu0 %v3942_v48, %s3813_s10 }
 0x3d8   :  { %v644_v29 = vpop.xlane.xlu1 %643 }
 0x3d9   :  { %3724 = vrcp.f32 %v644_v29 }
 0x3dc   :  { %v647_v30 = vpop.xlane.xlu0 %646  ;;  %v195_v34 = vpop.permute.xlu1 %194 }
 0x3dd   :  { %3726 = vrcp.f32 %v647_v30  ;;  %v873_v51 = vsel %vm687_vm3, %v195_v34, 0 }
 0x3e0   :  { %v193_v31 = vpop.permute.xlu0 %192  ;;  %v197_v38 = vpop.permute.xlu1 %196 }
 0x3e1   :  { %v827_v32 = vsel %vm687_vm3, %v193_v31, 0  ;;  %v919_v41 = vsel %vm687_vm3, %v197_v38, 0 }
 0x3e2   :  { %3385 = vmatpush3.bf16.msra.mxu1 %v827_v32 }
 0x3e3   :  { %v3725_v33 = vpop.eup %3724  ;;  %3396 = vmatprep.subr.bf16.mxu1 %v3809_v22 }
 0x3e4   :  { %v670_v35 = vmul.f32 %v3725_v33, %v3979_v54 }
 0x3e6   :  { %v678_v36 = vpack.c.bf16 %v670_v35, %v670_v35 }
 0x3e7   :  { %v3727_v37 = vpop.eup %3726 }
 0x3e8   :  { %v671_v48 = vmul.f32 %v3727_v37, %v3983_v56  ;;  %3381 = vmatmul.mubr.msk.bf16.vlgmr.msra.gmra.mrb[20].mxu0 %vm587_vm4, %v678_v36 }
 0x3e9   :  { %3391 = vmatpush3.bf16.msra.mxu0 %v873_v51  ;;  %3392 = vmatprep.mubr.msk.bf16.mxu0 %vm3812_vm1, %v3809_v22 }
 0x3ea   :  { %v679_v40 = vpack.c.bf16 %v671_v48, %v671_v48  ;;  %3402 = vmatprep.subr.bf16.mxu0 %v3809_v22 }
 0x3ec   :  { %3387 = vmatmul.mubr.msk.bf16.vlgmr.msra.gmra.mrb[24].mxu1 %vm587_vm4, %v679_v40 }
 0x3ed   :  { %3397 = vmatpush3.bf16.msra.mxu1 %v919_v41  ;;  %3398 = vmatprep.mubr.msk.bf16.mxu1 %vm3812_vm1, %v3809_v22 }
 0x3ee   :  { %3408 = vmatprep.subr.bf16.mxu1 %v3809_v22 }
 0x411   :  { %v650_v42 = vpop.xlane.xlu1 %649  ;;  %v653_v43 = vpop.xlane.xlu0 %652 }
 0x412   :  { %3728 = vrcp.f32 %v650_v42 }
 0x413   :  { %3730 = vrcp.f32 %v653_v43 }
 0x415   :  { %v656_v44 = vpop.xlane.xlu1 %655  ;;  %v659_v45 = vpop.xlane.xlu0 %658 }
 0x416   :  { %3732 = vrcp.f32 %v656_v44 }
 0x417   :  { %3734 = vrcp.f32 %v659_v45 }
 0x419   :  { %v199_v52 = vpop.permute.xlu0 %198  ;;  %v201_v53 = vpop.permute.xlu1 %200 }
 0x41a   :  { %v965_v58 = vsel %vm687_vm3, %v199_v52, 0  ;;  %v1011_v59 = vsel %vm687_vm3, %v201_v53, 0 }
 0x41c   :  { %v3729_v46 = vpop.eup %3728 }
 0x41d   :  { %v3731_v47 = vpop.eup %3730  ;;  %v672_v49 = vmul.f32 %v3729_v46, %v3994_v10 }
 0x41e   :  { %v673_v50 = vmul.f32 %v3731_v47, %v3996_v14 }
 0x41f   :  { %v680_v54 = vpack.c.bf16 %v672_v49, %v672_v49  ;;  %v64_v49 = vld [vmem:[%s4502_s3 + $0x1] ss:$0 sm:$0xff] }
 0x420   :  { %v3733_v55 = vpop.eup %3732  ;;  %v681_v56 = vpack.c.bf16 %v673_v50, %v673_v50 }
 0x421   :  { %v3735_v57 = vpop.eup %3734  ;;  %3393 = vmatmul.mubr.msk.bf16.vlgmr.msra.gmra.mrb[24].mxu0 %vm587_vm4, %v680_v54  ;;  %v674_v60 = vmul.f32 %v3733_v55, %v3998_v15  ;;  %v3657_v15 = vld [vmem:[%s4500_s1 + $0x5c] ss:$20 sps:$4 sm:$0xff]  }
 0x422   :  { %3399 = vmatmul.mubr.msk.bf16.vlgmr.msra.gmra.mrb[28].mxu1 %vm587_vm4, %v681_v56  ;;  %3403 = vmatpush3.bf16.msra.mxu0 %v965_v58  ;;  %v675_v61 = vmul.f32 %v3735_v57, %v4000_v16 }
 0x423   :  { %3409 = vmatpush3.bf16.msra.mxu1 %v1011_v59  ;;  %3404 = vmatprep.mubr.msk.bf16.mxu0 %vm3812_vm1, %v3809_v22  ;;  %v682_v63 = vpack.c.bf16 %v674_v60, %v674_v60 }
 0x424   :  { %3410 = vmatprep.mubr.msk.bf16.mxu1 %vm3812_vm1, %v3809_v22  ;;  %3414 = vmatprep.subr.bf16.mxu0 %v3809_v22  ;;  %v683_v0 = vpack.c.bf16 %v675_v61, %v675_v61 }
 0x425   :  { %3420 = vmatprep.subr.bf16.mxu1 %v3809_v22 }
 0x429   :  { %3405 = vmatmul.mubr.msk.bf16.vlgmr.msra.gmra.mrb[28].mxu0 %vm587_vm4, %v682_v63 }
 0x42a   :  { %3411 = vmatmul.mubr.msk.bf16.vlgmr.msra.gmra.mrb[32].mxu1 %vm587_vm4, %v683_v0  ;;  %3415 = vmatpush3.bf16.msra.mxu0 %v3655_v62 }
 0x42b   :  { %3416 = vmatprep.mubr.msk.bf16.mxu0 %vm3812_vm1, %v3809_v22  ;;  %3422 = vmatprep.mubr.msk.bf16.mxu1 %vm3812_vm1, %v3809_v22 }
 0x42c   :  { %3426 = vmatprep.subr.bf16.mxu0 %v3809_v22  ;;  %3421 = vmatpush3.bf16.msra.mxu1 %v3656_v1  ;;  %v21_v1 = vunpack.c.l.bf16 %v3869_v9 }
 0x42d   :  { %3432 = vmatprep.subr.bf16.mxu1 %v3809_v22 }
 0x45c   :  { %v771_v3 = vpop.f32.mrb[20].mxu1 }
 0x45d   :  { %v3376_v4 = vpop.f32.mrb[21].mxu1 }
 0x45e   :  { %v774_v5 = vpop.f32.mrb[22].mxu1 }
 0x45f   :  { %v3377_v6 = vpop.f32.mrb[23].mxu1 }
 0x460   :  { %v22_v6 = vunpack.c.h.bf16 %v3869_v9 }
 0x462   :  { %v725_v7 = vpop.f32.mrb[16].mxu0 }
 0x463   :  { %v1053_v8 = vpack.c.bf16 %v771_v3, %v725_v7  ;;  %v3370_v10 = vpop.f32.mrb[17].mxu0 }
 0x464   :  { %v728_v13 = vpop.f32.mrb[18].mxu0 }
 0x465   :  { %v3371_v14 = vpop.f32.mrb[19].mxu0  ;;  %3417 = vmatmul.mubr.msk.bf16.vlgmr.msra.gmra.mrb[32].mxu0 %vm204_vm2, %v1053_v8 }
 0x466   :  { %3428 = vmatprep.mubr.msk.bf16.mxu0 %vm3812_vm1, %v3809_v22  ;;  %3427 = vmatpush3.bf16.msra.mxu0 %v3657_v15 }
 0x467   :  { %3438 = vmatprep.subr.bf16.mxu0 %v3809_v22 }
 0x4bb   :  { %v817_v16 = vpop.f32.mrb[20].mxu0 }
 0x4bc   :  { %v3382_v17 = vpop.f32.mrb[21].mxu0 }
 0x4bd   :  { %v820_v18 = vpop.f32.mrb[22].mxu0 }
 0x4be   :  { %v3383_v19 = vpop.f32.mrb[23].mxu0 }
 0x4bf   :  { %v863_v20 = vpop.f32.mrb[24].mxu1 }
 0x4c0   :  { %v1106_v23 = vpack.c.bf16 %v863_v20, %v817_v16  ;;  %v3388_v24 = vpop.f32.mrb[25].mxu1 }
 0x4c1   :  { %v866_v25 = vpop.f32.mrb[26].mxu1 }
 0x4c2   :  { %v3389_v26 = vpop.f32.mrb[27].mxu1  ;;  %3423 = vmatmul.mubr.msk.bf16.vlgmr.msra.gmra.mrb[36].mxu1 %vm204_vm2, %v1106_v23 }
 0x4c3   :  { %3433 = vmatpush3.bf16.msra.mxu1 %v3658_v21  ;;  %3434 = vmatprep.mubr.msk.bf16.mxu1 %vm3812_vm1, %v3809_v22 }
 0x4c4   :  { %3450 = vmatprep.subr.bf16.mxu1 %v3809_v22 }
 0x4f4   :  { %v909_v27 = vpop.f32.mrb[24].mxu0 }
 0x4f5   :  { %v955_v28 = vpop.f32.mrb[28].mxu1  ;;  %v3394_v29 = vpop.f32.mrb[25].mxu0 }
 0x4f6   :  { %v1159_v30 = vpack.c.bf16 %v955_v28, %v909_v27  ;;  %v3400_v31 = vpop.f32.mrb[29].mxu1  ;;  %v912_v32 = vpop.f32.mrb[26].mxu0  ;;  %v3659_v27 = vld [vmem:[%s4500_s1 + $0x8] ss:$20 sps:$4 sm:$0xff]   ;;  %v3660_v28 = vld [vmem:[%s4500_s1 + $0x30] ss:$20 sps:$4 sm:$0xff]  }
 0x4f7   :  { %v958_v33 = vpop.f32.mrb[30].mxu1  ;;  %v3395_v34 = vpop.f32.mrb[27].mxu0  ;;  %v3661_v29 = vld [vmem:[%s4500_s1 + $0x58] ss:$20 sps:$4 sm:$0xff]   ;;  %v3663_v31 = vld [vmem:[%s4501_s2] sm:$0xff]  }
 0x4f8   :  { %v3401_v35 = vpop.f32.mrb[31].mxu1  ;;  %3429 = vmatmul.mubr.msk.bf16.vlgmr.msra.gmra.mrb[36].mxu0 %vm204_vm2, %v1159_v30  ;;  %v3662_v30 = vld [vmem:[%s4500_s1 + $0x80] ss:$20 sps:$4 sm:$0xff]   ;;  %v3664_v32 = vld [vmem:[%s4501_s2 + $0x8] sm:$0xff]   ;;  %v3666_v34 = vld [vmem:[%s4501_s2 + $0x18] sm:$0xff]  }
 0x4f9   :  { %3446 = vmatprep.mubr.msk.bf16.mxu0 %vm3812_vm1, %v3809_v22  ;;  %3439 = vmatpush3.bf16.msra.mxu0 %v3659_v27  ;;  %v3665_v33 = vld [vmem:[%s4501_s2 + $0x10] sm:$0xff]   ;;  %v3667_v35 = vld [vmem:[%s4501_s2 + $0x20] sm:$0xff]  }
 0x4fa   :  { %3440 = vmatprep.subr.bf16.mxu0 %v3809_v22  ;;  %v3673_v27 = vld [vmem:[%s4500_s1 + $0xa4] ss:$20 sps:$4 sm:$0xff]  }
 0x4fc   :  { %v1001_v36 = vpop.f32.mrb[28].mxu0 }
 0x4fd   :  { %v1047_v37 = vpop.f32.mrb[32].mxu1  ;;  %v3406_v51 = vpop.f32.mrb[29].mxu0  ;;  %3441 = vmatpush3.bf16.msra.mxu0 %v3660_v28  ;;  %v3671_v28 = vld [vmem:[%s4500_s1 + $0xa0] ss:$20 sps:$4 sm:$0xff]  }
 0x4fe   :  { %v1212_v48 = vpack.c.bf16 %v1047_v37, %v1001_v36  ;;  %v3412_v38 = vpop.f32.mrb[33].mxu1  ;;  %v1004_v40 = vpop.f32.mrb[30].mxu0  ;;  %3442 = vmatprep.subr.bf16.mxu0 %v3809_v22  ;;  %v3668_v36 = vld [vmem:[%s4501_s2 + $0x28] sm:$0xff]  }
 0x4ff   :  { %v1050_v41 = vpop.f32.mrb[34].mxu1  ;;  %v3407_v42 = vpop.f32.mrb[31].mxu0 }
 0x500   :  { %v3413_v43 = vpop.f32.mrb[35].mxu1  ;;  %3435 = vmatmul.mubr.msk.bf16.vlgmr.msra.gmra.mrb[40].mxu1 %vm204_vm2, %v1212_v48 }
 0x501   :  { %3466 = vmatprep.mubr.msk.bf16.mxu1 %vm3812_vm1, %v3809_v22  ;;  %3443 = vmatpush3.bf16.msra.mxu0 %v3661_v29  ;;  %v3676_v29 = vld [vmem:[%s4500_s1 + $0xcc] ss:$20 sps:$4 sm:$0xff]  }
 0x502   :  { %3444 = vmatprep.subr.bf16.mxu0 %v3809_v22  ;;  %3451 = vmatpush3.bf16.msra.mxu1 %v3663_v31  ;;  %v3679_v31 = vld [vmem:[%s4500_s1 + $0xf4] ss:$20 sps:$4 sm:$0xff]  }
 0x503   :  { %3452 = vmatprep.subr.bf16.mxu1 %v3809_v22 }
 0x505   :  { %3445 = vmatpush3.bf16.msra.mxu0 %v3662_v30  ;;  %v3674_v30 = vld [vmem:[%s4500_s1 + $0xc8] ss:$20 sps:$4 sm:$0xff]  }
 0x506   :  { %3453 = vmatpush3.bf16.msra.mxu1 %v3664_v32  ;;  %1597 = vmatprep.subr.bf16.mxu0 %v3673_v27  ;;  %v3677_v32 = vld [vmem:[%s4500_s1 + $0xf0] ss:$20 sps:$4 sm:$0xff]  }
 0x507   :  { %3454 = vmatprep.subr.bf16.mxu1 %v3809_v22 }
 0x50a   :  { %3455 = vmatpush3.bf16.msra.mxu1 %v3665_v33  ;;  %v3680_v33 = vld [vmem:[%s4500_s1 + $0x118] ss:$20 sps:$4 sm:$0xff]  }
 0x50b   :  { %3456 = vmatprep.subr.bf16.mxu1 %v3809_v22 }
 0x50e   :  { %3457 = vmatpush3.bf16.msra.mxu1 %v3666_v34  ;;  %v3682_v34 = vld [vmem:[%s4500_s1 + $0x11c] ss:$20 sps:$4 sm:$0xff]  }
 0x50f   :  { %3458 = vmatprep.subr.bf16.mxu1 %v3809_v22 }
 0x512   :  { %3459 = vmatpush3.bf16.msra.mxu1 %v3667_v35 }
 0x513   :  { %3460 = vmatprep.subr.bf16.mxu1 %v3809_v22 }
 0x516   :  { %3461 = vmatpush3.bf16.msra.mxu1 %v3668_v36 }
 0x517   :  { %3462 = vmatprep.subr.bf16.mxu1 %v3809_v22 }
 0x538   :  { %v1097_v44 = vpop.f32.mrb[32].mxu0 }
 0x539   :  { %v3418_v45 = vpop.f32.mrb[33].mxu0  ;;  %v1104_v50 = vadd.f32 %v1097_v44, %v64_v49  ;;  %v65_v44 = vld [vmem:[%s4502_s3 + $0x2] ss:$0 sm:$0xff] }
 0x53a   :  { %v1100_v46 = vpop.f32.mrb[34].mxu0 }
 0x53b   :  { %v3419_v47 = vpop.f32.mrb[35].mxu0  ;;  %v1105_v53 = vadd.f32 %v1100_v46, %v64_v49  ;;  %v66_v49 = vld [vmem:[%s4502_s3 + $0x3] ss:$0 sm:$0xff] }
 0x595   :  { %v1150_v52 = vpop.f32.mrb[36].mxu1 }
 0x596   :  { %v1157_v54 = vadd.f32 %v1150_v52, %v1104_v50  ;;  %v3424_v55 = vpop.f32.mrb[37].mxu1 }
 0x597   :  { %v1153_v56 = vpop.f32.mrb[38].mxu1  ;;  %v3669_v55 = vld [vmem:[%s4501_s2 + $0x30] sm:$0xff]  }
 0x598   :  { %v1158_v57 = vadd.f32 %v1153_v56, %v1105_v53  ;;  %v3425_v58 = vpop.f32.mrb[39].mxu1  ;;  %3463 = vmatpush3.bf16.msra.mxu1 %v3669_v55  ;;  %v3670_v56 = vld [vmem:[%s4501_s2 + $0x38] sm:$0xff]  }
 0x599   :  { %3464 = vmatprep.subr.bf16.mxu1 %v3809_v22 }
 0x59c   :  { %3465 = vmatpush3.bf16.msra.mxu1 %v3670_v56 }
 0x59d   :  { %3476 = vmatprep.subr.bf16.mxu1 %v3809_v22 }
 0x5cb   :  { %v1203_v59 = vpop.f32.mrb[36].mxu0 }
 0x5cc   :  { %v1210_v60 = vadd.f32 %v1203_v59, %v1157_v54  ;;  %v3430_v61 = vpop.f32.mrb[37].mxu0 }
 0x5cd   :  { %v1206_v62 = vpop.f32.mrb[38].mxu0 }
 0x5ce   :  { %v1211_v63 = vadd.f32 %v1206_v62, %v1158_v57  ;;  %v3431_v0 = vpop.f32.mrb[39].mxu0  ;;  %v67_v57 = vld [vmem:[%s4502_s3 + $0x4] ss:$0 sm:$0xff] }
 0x5d3   :  { %v1256_v3 = vpop.f32.mrb[40].mxu1 }
 0x5d4   :  { %v1263_v4 = vadd.f32 %v1256_v3, %v1210_v60  ;;  %v3436_v5 = vpop.f32.mrb[41].mxu1  ;;  %v68_v3 = vld [vmem:[%s4502_s3 + $0x5] ss:$0 sm:$0xff] }
 0x5d5   :  { %v1259_v7 = vpop.f32.mrb[42].mxu1 }
 0x5d6   :  { %v1264_v8 = vadd.f32 %v1259_v7, %v1211_v63  ;;  %v3437_v10 = vpop.f32.mrb[43].mxu1  ;;  %v1265_v13 = vadd.f32 %v1263_v4, %v21_v1 }
 0x5d8   :  { %v1267_v14 = vsel %vm123_vm0, %v1265_v13, 0.0  ;;  %v1266_v15 = vadd.f32 %v1264_v8, %v22_v6 }
 0x5d9   :  { %1268 = vadd.xlane.f32.xlu0 %v1267_v14 }
 0x5da   :  { %v1270_v16 = vsel %vm123_vm0, %v1266_v15, 0.0 }
 0x5db   :  { %1271 = vadd.xlane.f32.xlu1 %v1270_v16 }
 0x666   :  { %v1269_v17 = vpop.xlane.xlu0 %1268 }
 0x667   :  { %v1274_v18 = vmul.f32 0.015625, %v1269_v17 }
 0x668   :  { %v1272_v19 = vpop.xlane.xlu1 %1271 }
 0x669   :  { %v1276_v20 = vsub.f32 %v1265_v13, %v1274_v18  ;;  %v1275_v21 = vmul.f32 0.015625, %v1272_v19 }
 0x66b   :  { %v1277_v23 = vsub.f32 %v1266_v15, %v1275_v21  ;;  %v1278_v24 = vmul.f32 %v1276_v20, %v1276_v20 }
 0x66d   :  { %v1280_v9 = vsel %vm123_vm0, %v1278_v24, 0.0  ;;  %v1279_v25 = vmul.f32 %v1277_v23, %v1277_v23 }
 0x66e   :  { %1281 = vadd.xlane.f32.xlu0 %v1280_v9 }
 0x66f   :  { %v1283_v26 = vsel %vm123_vm0, %v1279_v25, 0.0 }
 0x672   :  { %1284 = vadd.xlane.f32.xlu0 %v1283_v26 }
 0x6fb   :  { %v1282_v37 = vpop.xlane.xlu0 %1281 }
 0x6fc   :  { %v1286_v51 = vmul.f32 0.015625, %v1282_v37 }
 0x6fe   :  { %v1288_v48 = vadd.f32 1e-05, %v1286_v51 }
 0x6ff   :  { %v1285_v38 = vpop.xlane.xlu0 %1284 }
 0x700   :  { %3736 = vrsqrt.f32 %v1288_v48  ;;  %v1287_v40 = vmul.f32 0.015625, %v1285_v38 }
 0x702   :  { %v1289_v41 = vadd.f32 1e-05, %v1287_v40 }
 0x704   :  { %3738 = vrsqrt.f32 %v1289_v41  ;;  %v69_v41 = vld [vmem:[%s4502_s3 + $0x6] ss:$0 sm:$0xff] }
 0x70a   :  { %v3737_v42 = vpop.eup %3736 }
 0x70b   :  { %v1292_v43 = vmul.f32 %v3737_v42, %v1276_v20 }
 0x70d   :  { %v1294_v46 = vmul.f32 %v1292_v43, %v65_v44 }
 0x70e   :  { %v3739_v45 = vpop.eup %3738 }
 0x70f   :  { %v1293_v47 = vmul.f32 %v3739_v45, %v1277_v23  ;;  %v1296_v52 = vadd.f32 %v1294_v46, %v66_v49  ;;  %v70_v46 = vld [vmem:[%s4502_s3 + $0x7] ss:$0 sm:$0xff] }
 0x711   :  { %v1295_v50 = vmul.f32 %v1293_v47, %v65_v44 }
 0x713   :  { %v1297_v53 = vadd.f32 %v1295_v50, %v66_v49 }
 0x715   :  { %v1298_v54 = vpack.c.bf16 %v1297_v53, %v1296_v52 }
 0x717   :  { %3447 = vmatmul.mubr.msk.bf16.vlgmr.msra.gmra.mrb[40].mxu0 %vm123_vm0, %v1298_v54 }
 0x718   :  { %1629 = vmatprep.mubr.bf16.mxu0 %v3808_v2  ;;  %1598 = vmatpush1.bf16.msra.mxu0 %v3671_v28 }
 0x719   :  { %1599 = vmatprep.subr.bf16.mxu0 %v3676_v29 }
 0x71c   :  { %1600 = vmatpush1.bf16.msra.mxu0 %v3674_v30 }
 0x71d   :  { %1601 = vmatprep.subr.bf16.mxu0 %v3679_v31 }
 0x720   :  { %1602 = vmatpush1.bf16.msra.mxu0 %v3677_v32 }
 0x721   :  { %1603 = vmatprep.subr.bf16.mxu0 %v3682_v34 }
 0x724   :  { %1604 = vmatpush1.bf16.msra.mxu0 %v3680_v33 }
 0x725   :  { %3470 = vmatprep.subr.bf16.mxu0 %v3809_v22 }
 0x7ea   :  { %v1360_v58 = vpop.f32.mrb[40].mxu0 }
 0x7eb   :  { %v1361_v2 = vadd.f32 %v1360_v58, %v67_v57  ;;  %v3448_v59 = vpop.f32.mrb[41].mxu0 }
 0x7ec   :  { %v1363_v60 = vpop.f32.mrb[42].mxu0 }
 0x7ed   :  { %v1364_v61 = vadd.f32 %v1363_v60, %v67_v57  ;;  %v3449_v62 = vpop.f32.mrb[43].mxu0  ;;  %v1367_v63 = vmax.f32 %v1361_v2, 0.0 }
 0x7ef   :  { %v1368_v0 = vmax.f32 %v1364_v61, 0.0 }
 0x7f1   :  { %v1369_v1 = vpack.c.bf16 %v1368_v0, %v1367_v63 }
 0x7f3   :  { %3467 = vmatmul.mubr.bf16.vlgmr.msra.gmra.mrb[44].mxu1 %v1369_v1 }
 0x7f4   :  { %3478 = vmatprep.mubr.msk.bf16.mxu1 %vm3812_vm1, %v3809_v22 }
 0x8c6   :  { %v1452_v4 = vpop.f32.mrb[44].mxu1 }
 0x8c7   :  { %v1453_v5 = vadd.f32 %v1452_v4, %v68_v3  ;;  %v3468_v6 = vpop.f32.mrb[45].mxu1 }
 0x8c8   :  { %v1455_v7 = vpop.f32.mrb[46].mxu1 }
 0x8c9   :  { %v1456_v8 = vadd.f32 %v1455_v7, %v68_v3  ;;  %v3469_v10 = vpop.f32.mrb[47].mxu1  ;;  %v1459_v13 = vadd.f32 %v1453_v5, %v1296_v52 }
 0x8cb   :  { %v1461_v14 = vsel %vm123_vm0, %v1459_v13, 0.0  ;;  %v1460_v15 = vadd.f32 %v1456_v8, %v1297_v53  ;;  %v3146_v53 = vld [vmem:[%s4502_s3 + $0x20] ss:$8 sm:$0x3] }
 0x8cc   :  { %1462 = vadd.xlane.f32.xlu1 %v1461_v14  ;;  %v1547_v54 = vrot.slane %v3146_v53, %v75_v12 }
 0x8cd   :  { %v1464_v16 = vsel %vm123_vm0, %v1460_v15, 0.0 }
 0x8ce   :  { %1465 = vadd.xlane.f32.xlu0 %v1464_v16 }
 0x959   :  { %v1463_v17 = vpop.xlane.xlu1 %1462 }
 0x95a   :  { %v1467_v18 = vmul.f32 0.015625, %v1463_v17 }
 0x95b   :  { %v1466_v19 = vpop.xlane.xlu0 %1465 }
 0x95c   :  { %v1469_v20 = vsub.f32 %v1459_v13, %v1467_v18  ;;  %v1468_v21 = vmul.f32 0.015625, %v1466_v19  ;;  %v1551_v19 = vrot.slane %v3146_v53, %v79_v39 }
 0x95e   :  { %v1470_v23 = vsub.f32 %v1460_v15, %v1468_v21  ;;  %v1471_v24 = vmul.f32 %v1469_v20, %v1469_v20 }
 0x960   :  { %v1473_v9 = vsel %vm123_vm0, %v1471_v24, 0.0  ;;  %v1472_v25 = vmul.f32 %v1470_v23, %v1470_v23 }
 0x961   :  { %1474 = vadd.xlane.f32.xlu1 %v1473_v9 }
 0x962   :  { %v1476_v26 = vsel %vm123_vm0, %v1472_v25, 0.0 }
 0x963   :  { %1477 = vadd.xlane.f32.xlu0 %v1476_v26 }
 0x9ee   :  { %v1475_v35 = vpop.xlane.xlu1 %1474 }
 0x9ef   :  { %v1479_v36 = vmul.f32 0.015625, %v1475_v35 }
 0x9f0   :  { %v1478_v37 = vpop.xlane.xlu0 %1477 }
 0x9f1   :  { %v1481_v51 = vadd.f32 1e-05, %v1479_v36  ;;  %v1480_v48 = vmul.f32 0.015625, %v1478_v37 }
 0x9f3   :  { %3740 = vrsqrt.f32 %v1481_v51  ;;  %v1482_v38 = vadd.f32 1e-05, %v1480_v48 }
 0x9f5   :  { %3742 = vrsqrt.f32 %v1482_v38 }
 0x9fd   :  { %v3741_v40 = vpop.eup %3740 }
 0x9fe   :  { %v1485_v42 = vmul.f32 %v3741_v40, %v1469_v20 }
 0x9ff   :  { %v3743_v43 = vpop.eup %3742 }
 0xa00   :  { %v1487_v44 = vmul.f32 %v1485_v42, %v69_v41  ;;  %v1486_v45 = vmul.f32 %v3743_v43, %v1470_v23 }
 0xa02   :  { %v1488_v47 = vmul.f32 %v1486_v45, %v69_v41  ;;  %v4191_v49 = vadd.f32 %v1487_v44, %v70_v46 }
 0xa04   :  { %v4193_v50 = vadd.f32 %v1488_v47, %v70_v46 }
 0xa06   :  { %v1542_v52 = vpack.c.bf16 %v4193_v50, %v4191_v49 }
 0xa08   :  { %3162 = vmatmul.mubr.msk.bf16.vlgmr.msra.gmra.mrb[44].mxu0 %vm123_vm0, %v1542_v52 }
 0xa09   :  { %3472 = vmatprep.mubr.msk.bf16.mxu0 %vm3812_vm1, %v3809_v22 }
 0xadb   :  { %v1631_v55 = vpop.f32.mrb[44].mxu0 }
 0xadc   :  { %v1632_v56 = vadd.f32 %v1631_v55, %v1547_v54  ;;  %v1633_v57 = vpop.f32.mrb[45].mxu0 }
 0xadd   :  { %v1635_v58 = vpop.f32.mrb[46].mxu0  ;;  %v1634_v23 = vadd.f32 %v1633_v57, %v1551_v19 }
 0xade   :  { %v1640_v2 = vpack.c.bf16 %v1632_v56, %v1632_v56  ;;  %v1636_v59 = vadd.f32 %v1635_v58, %v1547_v54  ;;  %v1637_v60 = vpop.f32.mrb[47].mxu0 }
 0xadf   :  { %v1638_v9 = vadd.f32 %v1637_v60, %v1551_v19  ;;  %v4254_v11 = vpack.c.bf16 %v1634_v23, %v1634_v23 }
 0xae0   :  { %v1642_v61 = vpack.c.bf16 %v1636_v59, %v1636_v59  ;;  %1646 = vrot.lane.b32.xlu1 %v1640_v2, %s3811_s9 }
 0xae1   :  { %v4257_v39 = vpack.c.bf16 %v1638_v9, %v1638_v9  ;;  %v2156_v26 = vsel %vm687_vm3, %v4254_v11, 0 }
 0xae2   :  { %1648 = vrot.lane.b32.xlu0 %v1642_v61, %s3811_s9 }
 0xae3   :  { %v2202_v27 = vsel %vm687_vm3, %v4257_v39, 0 }
 0xae4   :  { %1650 = vrot.lane.b32.xlu1 %v1640_v2, %s3810_s0 }
 0xae6   :  { %1654 = vrot.lane.b32.xlu0 %v1640_v2, %s3813_s10 }
 0xae8   :  { %1652 = vrot.lane.b32.xlu1 %v1642_v61, %s3810_s0 }
 0xaea   :  { %1672 = vrot.lane.b32.xlu0 %v1640_v2, %s3814_s11 }
 0xaec   :  { %1656 = vrot.lane.b32.xlu1 %v1642_v61, %s3813_s10 }
 0xaf0   :  { %1720 = vrot.lane.b32.xlu1 %v1642_v61, %s3814_s11 }
 0xb52   :  { %v1647_v12 = vpop.permute.xlu1 %1646 }
 0xb53   :  { %1768 = vrot.lane.b32.xlu0 %v1647_v12, %s3814_s11 }
 0xb54   :  { %v1649_v62 = vpop.permute.xlu0 %1648 }
 0xb55   :  { %1816 = vrot.lane.b32.xlu1 %v1649_v62, %s3814_s11 }
 0xb56   :  { %v1651_v63 = vpop.permute.xlu1 %1650 }
 0xb57   :  { %1864 = vrot.lane.b32.xlu0 %v1651_v63, %s3814_s11 }
 0xb58   :  { %v1655_v0 = vpop.permute.xlu0 %1654 }
 0xb5a   :  { %v1653_v1 = vpop.permute.xlu1 %1652 }
 0xb5b   :  { %1960 = vrot.lane.b32.xlu0 %v1655_v0, %s3814_s11  ;;  %1912 = vrot.lane.b32.xlu1 %v1653_v1, %s3814_s11 }
 0xb5c   :  { %v1673_v3 = vpop.permute.xlu0 %1672 }
 0xb5d   :  { %v1678_v4 = vsel %vm204_vm2, %v1673_v3, 0 }
 0xb5e   :  { %3471 = vmatpush3.bf16.xpose.msra.mxu0 %v1678_v4  ;;  %v1657_v5 = vpop.permute.xlu1 %1656 }
 0xb5f   :  { %2008 = vrot.lane.b32.xlu1 %v1657_v5, %s3814_s11  ;;  %3482 = vmatprep.subr.bf16.mxu0 %v3809_v22 }
 0xb62   :  { %v1721_v6 = vpop.permute.xlu1 %1720 }
 0xb63   :  { %v1726_v7 = vsel %vm204_vm2, %v1721_v6, 0 }
 0xb64   :  { %3477 = vmatpush3.bf16.xpose.msra.mxu1 %v1726_v7 }
 0xb65   :  { %3473 = vmatmul.mubr.msk.bf16.vlgmr.msra.gmra.mrb[48].mxu0 %vm204_vm2, %v1640_v2  ;;  %3488 = vmatprep.subr.bf16.mxu1 %v3809_v22 }
 0xb66   :  { %3484 = vmatprep.mubr.msk.bf16.mxu0 %vm3812_vm1, %v3809_v22 }
 0xb6b   :  { %3479 = vmatmul.mubr.msk.bf16.vlgmr.msra.gmra.mrb[48].mxu1 %vm204_vm2, %v1642_v61 }
 0xb6c   :  { %3490 = vmatprep.mubr.msk.bf16.mxu1 %vm3812_vm1, %v3809_v22 }
 0xbc5   :  { %v1769_v8 = vpop.permute.xlu0 %1768 }
 0xbc6   :  { %v1774_v10 = vsel %vm204_vm2, %v1769_v8, 0 }
 0xbc7   :  { %3483 = vmatpush3.bf16.xpose.msra.mxu0 %v1774_v10  ;;  %v1817_v13 = vpop.permute.xlu1 %1816 }
 0xbc8   :  { %v1822_v14 = vsel %vm204_vm2, %v1817_v13, 0  ;;  %3494 = vmatprep.subr.bf16.mxu0 %v3809_v22 }
 0xbc9   :  { %3489 = vmatpush3.bf16.xpose.msra.mxu1 %v1822_v14  ;;  %v1865_v15 = vpop.permute.xlu0 %1864 }
 0xbca   :  { %3500 = vmatprep.subr.bf16.mxu1 %v3809_v22  ;;  %v1870_v17 = vsel %vm204_vm2, %v1865_v15, 0 }
 0xbcd   :  { %v1913_v16 = vpop.permute.xlu1 %1912  ;;  %v1961_v20 = vpop.permute.xlu0 %1960 }
 0xbce   :  { %3485 = vmatmul.mubr.msk.bf16.vlgmr.msra.gmra.mrb[52].mxu0 %vm204_vm2, %v1647_v12  ;;  %v1918_v18 = vsel %vm204_vm2, %v1913_v16, 0  ;;  %v1966_v24 = vsel %vm204_vm2, %v1961_v20, 0 }
 0xbcf   :  { %3495 = vmatpush3.bf16.xpose.msra.mxu0 %v1870_v17  ;;  %3496 = vmatprep.mubr.msk.bf16.mxu0 %vm3812_vm1, %v3809_v22 }
 0xbd0   :  { %3491 = vmatmul.mubr.msk.bf16.vlgmr.msra.gmra.mrb[52].mxu1 %vm204_vm2, %v1649_v62  ;;  %3506 = vmatprep.subr.bf16.mxu0 %v3809_v22 }
 0xbd1   :  { %3501 = vmatpush3.bf16.xpose.msra.mxu1 %v1918_v18  ;;  %3502 = vmatprep.mubr.msk.bf16.mxu1 %vm3812_vm1, %v3809_v22  ;;  %v2009_v21 = vpop.permute.xlu1 %2008 }
 0xbd2   :  { %3512 = vmatprep.subr.bf16.mxu1 %v3809_v22  ;;  %v2014_v25 = vsel %vm204_vm2, %v2009_v21, 0 }
 0xbd6   :  { %3497 = vmatmul.mubr.msk.bf16.vlgmr.msra.gmra.mrb[56].mxu0 %vm204_vm2, %v1651_v63 }
 0xbd7   :  { %3507 = vmatpush3.bf16.xpose.msra.mxu0 %v1966_v24  ;;  %3508 = vmatprep.mubr.msk.bf16.mxu0 %vm3812_vm1, %v3809_v22 }
 0xbd8   :  { %3503 = vmatmul.mubr.msk.bf16.vlgmr.msra.gmra.mrb[56].mxu1 %vm204_vm2, %v1653_v1  ;;  %3518 = vmatprep.subr.bf16.mxu0 %v3809_v22 }
 0xbd9   :  { %3513 = vmatpush3.bf16.xpose.msra.mxu1 %v2014_v25  ;;  %3514 = vmatprep.mubr.msk.bf16.mxu1 %vm3812_vm1, %v3809_v22 }
 0xbda   :  { %3524 = vmatprep.subr.bf16.mxu1 %v3809_v22 }
 0xbde   :  { %3509 = vmatmul.mubr.msk.bf16.vlgmr.msra.gmra.mrb[60].mxu0 %vm204_vm2, %v1655_v0 }
 0xbdf   :  { %3519 = vmatpush3.bf16.msra.mxu0 %v2156_v26  ;;  %3520 = vmatprep.mubr.msk.bf16.mxu0 %vm3812_vm1, %v3809_v22 }
 0xbe0   :  { %3515 = vmatmul.mubr.msk.bf16.vlgmr.msra.gmra.mrb[60].mxu1 %vm204_vm2, %v1657_v5  ;;  %3530 = vmatprep.subr.bf16.mxu0 %v3809_v22 }
 0xbe1   :  { %3525 = vmatpush3.bf16.msra.mxu1 %v2202_v27  ;;  %3526 = vmatprep.mubr.msk.bf16.mxu1 %vm3812_vm1, %v3809_v22 }
 0xbe2   :  { %3536 = vmatprep.subr.bf16.mxu1 %v3809_v22 }
 0xc38   :  { %v1714_v28 = vpop.f32.mrb[48].mxu0 }
 0xc39   :  { %v3474_v29 = vpop.f32.mrb[49].mxu0  ;;  %v2056_v30 = vsel %vm587_vm4, %v1714_v28, -inf }
 0xc3a   :  { %v1717_v31 = vpop.f32.mrb[50].mxu0  ;;  %2057 = vmax.xlane.f32.xlu0 %v2056_v30 }
 0xc3b   :  { %v3475_v32 = vpop.f32.mrb[51].mxu0 }
 0xc3e   :  { %v1762_v33 = vpop.f32.mrb[48].mxu1 }
 0xc3f   :  { %v3480_v34 = vpop.f32.mrb[49].mxu1  ;;  %v2059_v35 = vsel %vm587_vm4, %v1762_v33, -inf }
 0xc40   :  { %2060 = vmax.xlane.f32.xlu1 %v2059_v35  ;;  %v1765_v36 = vpop.f32.mrb[50].mxu1 }
 0xc41   :  { %v3481_v37 = vpop.f32.mrb[51].mxu1 }
 0xca1   :  { %v1810_v51 = vpop.f32.mrb[52].mxu0 }
 0xca2   :  { %v3486_v48 = vpop.f32.mrb[53].mxu0  ;;  %v2062_v38 = vsel %vm587_vm4, %v1810_v51, -inf }
 0xca3   :  { %v1813_v40 = vpop.f32.mrb[54].mxu0  ;;  %2063 = vmax.xlane.f32.xlu0 %v2062_v38  ;;  %v1858_v41 = vpop.f32.mrb[52].mxu1 }
 0xca4   :  { %v3487_v42 = vpop.f32.mrb[55].mxu0  ;;  %v3492_v43 = vpop.f32.mrb[53].mxu1  ;;  %v2065_v46 = vsel %vm587_vm4, %v1858_v41, -inf }
 0xca5   :  { %v1861_v44 = vpop.f32.mrb[54].mxu1 }
 0xca6   :  { %v3493_v45 = vpop.f32.mrb[55].mxu1 }
 0xca7   :  { %2066 = vmax.xlane.f32.xlu0 %v2065_v46 }
 0xca9   :  { %v1906_v47 = vpop.f32.mrb[56].mxu0 }
 0xcaa   :  { %v3498_v52 = vpop.f32.mrb[57].mxu0  ;;  %v2068_v53 = vsel %vm587_vm4, %v1906_v47, -inf }
 0xcab   :  { %v1909_v54 = vpop.f32.mrb[58].mxu0  ;;  %2069 = vmax.xlane.f32.xlu1 %v2068_v53  ;;  %v1954_v55 = vpop.f32.mrb[56].mxu1 }
 0xcac   :  { %v3499_v56 = vpop.f32.mrb[59].mxu0  ;;  %v3504_v57 = vpop.f32.mrb[57].mxu1  ;;  %v2071_v58 = vsel %vm587_vm4, %v1954_v55, -inf }
 0xcad   :  { %2072 = vmax.xlane.f32.xlu0 %v2071_v58  ;;  %v1957_v2 = vpop.f32.mrb[58].mxu1 }
 0xcae   :  { %v3505_v59 = vpop.f32.mrb[59].mxu1 }
 0xcb1   :  { %v2002_v60 = vpop.f32.mrb[60].mxu0 }
 0xcb2   :  { %v3510_v61 = vpop.f32.mrb[61].mxu0  ;;  %v2074_v12 = vsel %vm587_vm4, %v2002_v60, -inf }
 0xcb3   :  { %v2005_v62 = vpop.f32.mrb[62].mxu0  ;;  %2075 = vmax.xlane.f32.xlu1 %v2074_v12  ;;  %v2050_v63 = vpop.f32.mrb[60].mxu1 }
 0xcb4   :  { %v3511_v0 = vpop.f32.mrb[63].mxu0  ;;  %v3516_v1 = vpop.f32.mrb[61].mxu1  ;;  %v2077_v3 = vsel %vm587_vm4, %v2050_v63, -inf }
 0xcb5   :  { %2078 = vmax.xlane.f32.xlu0 %v2077_v3  ;;  %v2053_v4 = vpop.f32.mrb[62].mxu1 }
 0xcb6   :  { %v3517_v5 = vpop.f32.mrb[63].mxu1 }
 0xcc4   :  { %1660 = vrot.lane.b32.xlu1 %v4254_v11, %s3811_s9 }
 0xcc7   :  { %v2058_v8 = vpop.xlane.xlu0 %2057 }
 0xcc8   :  { %v2080_v13 = vsub.f32 %v1714_v28, %v2058_v8 }
 0xcca   :  { %v2088_v14 = vmul.f32 1.442695, %v2080_v13 }
 0xccd   :  { %v2061_v6 = vpop.xlane.xlu1 %2060 }
 0xcce   :  { %v2081_v7 = vsub.f32 %v1762_v33, %v2061_v6 }
 0xcd0   :  { %v2090_v10 = vmul.f32 1.442695, %v2081_v7 }
 0xcd2   :  { %3744 = vpow2.f32 %v2090_v10 }
 0xcd3   :  { %3746 = vpow2.f32 %v2088_v14 }
 0xcdc   :  { %v3745_v15 = vpop.eup %3744 }
 0xcdd   :  { %v2107_v16 = vsel %vm587_vm4, %v3745_v15, 0.0  ;;  %v3747_v17 = vpop.eup %3746 }
 0xcde   :  { %2108 = vadd.xlane.f32.xlu0 %v2107_v16  ;;  %v2104_v18 = vsel %vm587_vm4, %v3747_v17, 0.0 }
 0xce8   :  { %2105 = vadd.xlane.f32.xlu1 %v2104_v18 }
 0xd30   :  { %v2064_v19 = vpop.xlane.xlu0 %2063 }
 0xd31   :  { %v2082_v20 = vsub.f32 %v1810_v51, %v2064_v19 }
 0xd33   :  { %v2092_v21 = vmul.f32 1.442695, %v2082_v20 }
 0xd34   :  { %v2067_v23 = vpop.xlane.xlu0 %2066 }
 0xd35   :  { %3748 = vpow2.f32 %v2092_v21  ;;  %v2083_v24 = vsub.f32 %v1858_v41, %v2067_v23 }
 0xd37   :  { %v2094_v9 = vmul.f32 1.442695, %v2083_v24 }
 0xd38   :  { %v2070_v29 = vpop.xlane.xlu1 %2069 }
 0xd39   :  { %3750 = vpow2.f32 %v2094_v9  ;;  %v2084_v31 = vsub.f32 %v1906_v47, %v2070_v29 }
 0xd3a   :  { %v2073_v30 = vpop.xlane.xlu0 %2072 }
 0xd3b   :  { %v2085_v32 = vsub.f32 %v1954_v55, %v2073_v30  ;;  %v2096_v35 = vmul.f32 1.442695, %v2084_v31  ;;  %v3683_v31 = vld [vmem:[%s4500_s1 + $0xac] ss:$20 sps:$4 sm:$0xff]  }
 0xd3d   :  { %v2098_v36 = vmul.f32 1.442695, %v2085_v32  ;;  %3752 = vpow2.f32 %v2096_v35 }
 0xd3f   :  { %v4283_v25 = vpop.eup %3748  ;;  %3754 = vpow2.f32 %v2098_v36 }
 0xd40   :  { %v2110_v26 = vsel %vm587_vm4, %v4283_v25, 0.0  ;;  %v2076_v33 = vpop.xlane.xlu1 %2075 }
 0xd41   :  { %2111 = vadd.xlane.f32.xlu1 %v2110_v26  ;;  %v2086_v37 = vsub.f32 %v2002_v60, %v2076_v33  ;;  %v3684_v33 = vld [vmem:[%s4500_s1 + $0xd4] ss:$20 sps:$4 sm:$0xff]  }
 0xd42   :  { %v2079_v34 = vpop.xlane.xlu0 %2078 }
 0xd43   :  { %v4287_v27 = vpop.eup %3750  ;;  %v2087_v51 = vsub.f32 %v2050_v63, %v2079_v34  ;;  %v2100_v48 = vmul.f32 1.442695, %v2086_v37 }
 0xd44   :  { %v2113_v28 = vsel %vm587_vm4, %v4287_v27, 0.0  ;;  %v1661_v41 = vpop.permute.xlu1 %1660 }
 0xd45   :  { %2114 = vadd.xlane.f32.xlu0 %v2113_v28  ;;  %v2102_v40 = vmul.f32 1.442695, %v2087_v51  ;;  %v2248_v60 = vsel %vm687_vm3, %v1661_v41, 0 }
 0xd47   :  { %v4297_v42 = vpop.eup %3752 }
 0xd48   :  { %v2116_v53 = vsel %vm587_vm4, %v4297_v42, 0.0 }
 0xd49   :  { %v4299_v43 = vpop.eup %3754 }
 0xd4a   :  { %v2119_v52 = vsel %vm587_vm4, %v4299_v43, 0.0 }
 0xd52   :  { %1664 = vrot.lane.b32.xlu1 %v4254_v11, %s3810_s0 }
 0xd56   :  { %1666 = vrot.lane.b32.xlu1 %v4257_v39, %s3810_s0  ;;  %s3815_s0 = smov [#allocation2]  }
 0xd5b   :  { %1662 = vrot.lane.b32.xlu0 %v4257_v39, %s3811_s9  ;;  %s3051_s9 = sshll.u32 %s3815_s0, 4  ;;  %s3052_s9 = int_to_ptr.vmem [resolvable:$true] %s3051_s9 }
 0xd5c   :  { %p3789_p1 = scmp.lt.s32.totalorder %s3052_s9, %s3052_s9 }
 0xd6b   :  { %v2109_v38 = vpop.xlane.xlu0 %2108 }
 0xd6c   :  { %3756 = vrcp.f32 %v2109_v38 }
 0xd6d   :  { %3758 = vpow2.f32 %v2100_v48 }
 0xd6e   :  { %3760 = vpow2.f32 %v2102_v40 }
 0xd75   :  { %v2106_v44 = vpop.xlane.xlu1 %2105 }
 0xd76   :  { %v3757_v45 = vpop.eup %3756  ;;  %3762 = vrcp.f32 %v2106_v44 }
 0xd77   :  { %v2137_v46 = vmul.f32 %v3757_v45, %v3745_v15  ;;  %v4301_v47 = vpop.eup %3758 }
 0xd78   :  { %v4307_v55 = vpop.eup %3760  ;;  %v2122_v57 = vsel %vm587_vm4, %v4301_v47, 0.0 }
 0xd79   :  { %v2145_v54 = vpack.c.bf16 %v2137_v46, %v2137_v46  ;;  %v2125_v56 = vsel %vm587_vm4, %v4307_v55, 0.0 }
 0xd7a   :  { %2120 = vadd.xlane.f32.xlu0 %v2119_v52  ;;  %2117 = vadd.xlane.f32.xlu1 %v2116_v53  ;;  %v3686_v52 = vld [vmem:[%s4500_s1 + $0x124] ss:$20 sps:$4 sm:$0xff]  }
 0xd7b   :  { %3527 = vmatmul.mubr.msk.bf16.vlgmr.msra.gmra.mrb[64].mxu1 %vm587_vm4, %v2145_v54 }
 0xd7c   :  { %3538 = vmatprep.mubr.msk.bf16.mxu1 %vm3812_vm1, %v3809_v22 }
 0xd7e   :  { %2126 = vadd.xlane.f32.xlu0 %v2125_v56  ;;  %2123 = vadd.xlane.f32.xlu1 %v2122_v57 }
 0xd80   :  { %v3763_v58 = vpop.eup %3762 }
 0xd81   :  { %v2136_v2 = vmul.f32 %v3763_v58, %v3747_v17 }
 0xd83   :  { %v2144_v59 = vpack.c.bf16 %v2136_v2, %v2136_v2 }
 0xd85   :  { %3521 = vmatmul.mubr.msk.bf16.vlgmr.msra.gmra.mrb[64].mxu0 %vm587_vm4, %v2144_v59 }
 0xd86   :  { %3531 = vmatpush3.bf16.msra.mxu0 %v2248_v60  ;;  %3532 = vmatprep.mubr.msk.bf16.mxu0 %vm3812_vm1, %v3809_v22 }
 0xd87   :  { %3542 = vmatprep.subr.bf16.mxu0 %v3809_v22 }
 0xd8f   :  { %1670 = vrot.lane.b32.xlu1 %v4257_v39, %s3813_s10 }
 0xd94   :  { %1668 = vrot.lane.b32.xlu0 %v4254_v11, %s3813_s10  ;;  %s3784_s10 = scalar_lea.vmem %s3052_s9, 32 }
 0xd95   :  { %p3785_p0 = scmp.ne.s32.totalorder %s3052_s9, %s3784_s10  ;;  %p3790_p2 = scmp.lt.s32.totalorder %s3784_s10, %s3784_s10 }
 0xd97   :  { %p3791_p3 = por %p3790_p2, %p3789_p1 }
 0xd99   :  { %p3792_p4 = pnand %p3791_p3, %p3785_p0 }
 0xdce   :  { %v2112_v61 = vpop.xlane.xlu1 %2111 }
 0xdcf   :  { %3764 = vrcp.f32 %v2112_v61 }
 0xdd2   :  { %v2115_v12 = vpop.xlane.xlu0 %2114  ;;  %v1665_v1 = vpop.permute.xlu1 %1664 }
 0xdd3   :  { %3766 = vrcp.f32 %v2115_v12  ;;  %v2340_v11 = vsel %vm687_vm3, %v1665_v1, 0 }
 0xdd6   :  { %v1663_v62 = vpop.permute.xlu0 %1662  ;;  %v1667_v6 = vpop.permute.xlu1 %1666 }
 0xdd7   :  { %v2294_v63 = vsel %vm687_vm3, %v1663_v62, 0  ;;  %v2386_v8 = vsel %vm687_vm3, %v1667_v6, 0 }
 0xdd8   :  { %3537 = vmatpush3.bf16.msra.mxu1 %v2294_v63 }
 0xdd9   :  { %v3765_v0 = vpop.eup %3764  ;;  %3548 = vmatprep.subr.bf16.mxu1 %v3809_v22 }
 0xdda   :  { %v2138_v3 = vmul.f32 %v3765_v0, %v4283_v25 }
 0xddc   :  { %v2146_v4 = vpack.c.bf16 %v2138_v3, %v2138_v3 }
 0xddd   :  { %v3767_v5 = vpop.eup %3766 }
 0xdde   :  { %v2139_v39 = vmul.f32 %v3767_v5, %v4287_v27  ;;  %3533 = vmatmul.mubr.msk.bf16.vlgmr.msra.gmra.mrb[68].mxu0 %vm587_vm4, %v2146_v4 }
 0xddf   :  { %3543 = vmatpush3.bf16.msra.mxu0 %v2340_v11  ;;  %3544 = vmatprep.mubr.msk.bf16.mxu0 %vm3812_vm1, %v3809_v22 }
 0xde0   :  { %v2147_v7 = vpack.c.bf16 %v2139_v39, %v2139_v39  ;;  %3554 = vmatprep.subr.bf16.mxu0 %v3809_v22 }
 0xde2   :  { %3539 = vmatmul.mubr.msk.bf16.vlgmr.msra.gmra.mrb[68].mxu1 %vm587_vm4, %v2147_v7 }
 0xde3   :  { %3549 = vmatpush3.bf16.msra.mxu1 %v2386_v8  ;;  %3550 = vmatprep.mubr.msk.bf16.mxu1 %vm3812_vm1, %v3809_v22 }
 0xde4   :  { %3560 = vmatprep.subr.bf16.mxu1 %v3809_v22 }
 0xe07   :  { %v2121_v10 = vpop.xlane.xlu0 %2120  ;;  %v2118_v13 = vpop.xlane.xlu1 %2117 }
 0xe08   :  { %3768 = vrcp.f32 %v2121_v10 }
 0xe09   :  { %3770 = vrcp.f32 %v2118_v13 }
 0xe0b   :  { %v2127_v14 = vpop.xlane.xlu0 %2126  ;;  %v2124_v15 = vpop.xlane.xlu1 %2123 }
 0xe0c   :  { %3772 = vrcp.f32 %v2127_v14 }
 0xe0d   :  { %3774 = vrcp.f32 %v2124_v15  ;;  %v3147_v15 = vld [vmem:[%s4502_s3 + $0x21] ss:$0 sm:$0xff] }
 0xe0f   :  { %v1671_v20 = vpop.permute.xlu1 %1670  ;;  %v1669_v21 = vpop.permute.xlu0 %1668 }
 0xe10   :  { %v2478_v26 = vsel %vm687_vm3, %v1671_v20, 0  ;;  %v2432_v27 = vsel %vm687_vm3, %v1669_v21, 0 }
 0xe12   :  { %v3769_v16 = vpop.eup %3768 }
 0xe13   :  { %v3771_v17 = vpop.eup %3770  ;;  %v2141_v18 = vmul.f32 %v3769_v16, %v4299_v43 }
 0xe14   :  { %v2140_v19 = vmul.f32 %v3771_v17, %v4297_v42  ;;  %v3685_v42 = vld [vmem:[%s4500_s1 + $0xfc] ss:$20 sps:$4 sm:$0xff]  }
 0xe15   :  { %v2149_v23 = vpack.c.bf16 %v2141_v18, %v2141_v18 }
 0xe16   :  { %v3773_v24 = vpop.eup %3772  ;;  %v2148_v9 = vpack.c.bf16 %v2140_v19, %v2140_v19 }
 0xe17   :  { %v3775_v25 = vpop.eup %3774  ;;  %3551 = vmatmul.mubr.msk.bf16.vlgmr.msra.gmra.mrb[72].mxu1 %vm587_vm4, %v2149_v23  ;;  %v2143_v28 = vmul.f32 %v3773_v24, %v4307_v55 }
 0xe18   :  { %3545 = vmatmul.mubr.msk.bf16.vlgmr.msra.gmra.mrb[72].mxu0 %vm587_vm4, %v2148_v9  ;;  %3561 = vmatpush3.bf16.msra.mxu1 %v2478_v26  ;;  %v2142_v29 = vmul.f32 %v3775_v25, %v4301_v47 }
 0xe19   :  { %3555 = vmatpush3.bf16.msra.mxu0 %v2432_v27  ;;  %3556 = vmatprep.mubr.msk.bf16.mxu0 %vm3812_vm1, %v3809_v22  ;;  %v2151_v30 = vpack.c.bf16 %v2143_v28, %v2143_v28 }
 0xe1a   :  { %3562 = vmatprep.mubr.msk.bf16.mxu1 %vm3812_vm1, %v3809_v22  ;;  %3566 = vmatprep.subr.bf16.mxu0 %v3809_v22  ;;  %v2150_v32 = vpack.c.bf16 %v2142_v29, %v2142_v29 }
 0xe1b   :  { %3572 = vmatprep.subr.bf16.mxu1 %v3809_v22 }
 0xe1f   :  { %3563 = vmatmul.mubr.msk.bf16.vlgmr.msra.gmra.mrb[76].mxu1 %vm587_vm4, %v2151_v30 }
 0xe20   :  { %3557 = vmatmul.mubr.msk.bf16.vlgmr.msra.gmra.mrb[76].mxu0 %vm587_vm4, %v2150_v32  ;;  %3574 = vmatprep.mubr.msk.bf16.mxu1 %vm3812_vm1, %v3809_v22 }
 0xe21   :  { %3567 = vmatpush3.bf16.msra.mxu0 %v3683_v31  ;;  %3568 = vmatprep.mubr.msk.bf16.mxu0 %vm3812_vm1, %v3809_v22 }
 0xe22   :  { %3578 = vmatprep.subr.bf16.mxu0 %v3809_v22  ;;  %3573 = vmatpush3.bf16.msra.mxu1 %v3684_v33 }
 0xe23   :  { %3584 = vmatprep.subr.bf16.mxu1 %v3809_v22 }
 0xe4e   :  { %v2238_v34 = vpop.f32.mrb[64].mxu1 }
 0xe4f   :  { %v3528_v35 = vpop.f32.mrb[65].mxu1 }
 0xe50   :  { %v2241_v36 = vpop.f32.mrb[66].mxu1 }
 0xe51   :  { %v3529_v37 = vpop.f32.mrb[67].mxu1 }
 0xe58   :  { %v2192_v51 = vpop.f32.mrb[64].mxu0 }
 0xe59   :  { %v2520_v48 = vpack.c.bf16 %v2238_v34, %v2192_v51  ;;  %v3522_v38 = vpop.f32.mrb[65].mxu0 }
 0xe5a   :  { %v2195_v40 = vpop.f32.mrb[66].mxu0 }
 0xe5b   :  { %v3523_v41 = vpop.f32.mrb[67].mxu0  ;;  %3569 = vmatmul.mubr.msk.bf16.vlgmr.msra.gmra.mrb[80].mxu0 %vm204_vm2, %v2520_v48 }
 0xe5c   :  { %3580 = vmatprep.mubr.msk.bf16.mxu0 %vm3812_vm1, %v3809_v22  ;;  %3579 = vmatpush3.bf16.msra.mxu0 %v3685_v42 }
 0xe5d   :  { %3590 = vmatprep.subr.bf16.mxu0 %v3809_v22 }
 0xeb1   :  { %v2284_v43 = vpop.f32.mrb[68].mxu0 }
 0xeb2   :  { %v3534_v44 = vpop.f32.mrb[69].mxu0 }
 0xeb3   :  { %v2287_v45 = vpop.f32.mrb[70].mxu0 }
 0xeb4   :  { %v3535_v46 = vpop.f32.mrb[71].mxu0 }
 0xeb5   :  { %v2330_v47 = vpop.f32.mrb[68].mxu1 }
 0xeb6   :  { %v2573_v53 = vpack.c.bf16 %v2330_v47, %v2284_v43  ;;  %v3540_v54 = vpop.f32.mrb[69].mxu1 }
 0xeb7   :  { %v2333_v55 = vpop.f32.mrb[70].mxu1  ;;  %v3690_v54 = vld [vmem:[%s4500_s1 + $0x120] ss:$20 sps:$4 sm:$0xff]  }
 0xeb8   :  { %v3541_v56 = vpop.f32.mrb[71].mxu1  ;;  %3575 = vmatmul.mubr.msk.bf16.vlgmr.msra.gmra.mrb[80].mxu1 %vm204_vm2, %v2573_v53  ;;  %v3689_v53 = vld [vmem:[%s4500_s1 + $0xf8] ss:$20 sps:$4 sm:$0xff]   ;;  %v3691_v55 = vld [vmem:[%s4501_s2 + $0x40] sm:$0xff]  }
 0xeb9   :  { %3585 = vmatpush3.bf16.msra.mxu1 %v3686_v52  ;;  %3586 = vmatprep.mubr.msk.bf16.mxu1 %vm3812_vm1, %v3809_v22  ;;  %v3688_v52 = vld [vmem:[%s4500_s1 + $0xd0] ss:$20 sps:$4 sm:$0xff]   ;;  %v3692_v56 = vld [vmem:[%s4501_s2 + $0x48] sm:$0xff]  }
 0xeba   :  { %3602 = vmatprep.subr.bf16.mxu1 %v3809_v22 }
 0xeea   :  { %v2422_v57 = vpop.f32.mrb[72].mxu1 }
 0xeeb   :  { %v2376_v58 = vpop.f32.mrb[72].mxu0  ;;  %v3552_v2 = vpop.f32.mrb[73].mxu1 }
 0xeec   :  { %v2626_v59 = vpack.c.bf16 %v2422_v57, %v2376_v58  ;;  %v3546_v60 = vpop.f32.mrb[73].mxu0  ;;  %v2425_v61 = vpop.f32.mrb[74].mxu1  ;;  %v3693_v57 = vld [vmem:[%s4501_s2 + $0x50] sm:$0xff]   ;;  %v3694_v58 = vld [vmem:[%s4501_s2 + $0x58] sm:$0xff]   ;;  %v3695_v2 = vld [vmem:[%s4501_s2 + $0x60] sm:$0xff]  }
 0xeed   :  { %v2379_v12 = vpop.f32.mrb[74].mxu0  ;;  %v3553_v62 = vpop.f32.mrb[75].mxu1 }
 0xeee   :  { %v3547_v63 = vpop.f32.mrb[75].mxu0  ;;  %3581 = vmatmul.mubr.msk.bf16.vlgmr.msra.gmra.mrb[84].mxu0 %vm204_vm2, %v2626_v59  ;;  %v3696_v59 = vld [vmem:[%s4501_s2 + $0x68] sm:$0xff]  }
 0xeef   :  { %3598 = vmatprep.mubr.msk.bf16.mxu0 %vm3812_vm1, %v3809_v22 }
 0xef2   :  { %v2514_v0 = vpop.f32.mrb[76].mxu1 }
 0xef3   :  { %v2468_v1 = vpop.f32.mrb[76].mxu0  ;;  %v3564_v3 = vpop.f32.mrb[77].mxu1 }
 0xef4   :  { %v2679_v4 = vpack.c.bf16 %v2514_v0, %v2468_v1  ;;  %v3558_v5 = vpop.f32.mrb[77].mxu0  ;;  %v2517_v39 = vpop.f32.mrb[78].mxu1 }
 0xef5   :  { %v2471_v11 = vpop.f32.mrb[78].mxu0  ;;  %v3565_v6 = vpop.f32.mrb[79].mxu1 }
 0xef6   :  { %v3559_v7 = vpop.f32.mrb[79].mxu0  ;;  %3587 = vmatmul.mubr.msk.bf16.vlgmr.msra.gmra.mrb[84].mxu1 %vm204_vm2, %v2679_v4  ;;  %v3148_v4 = vld [vmem:[%s4502_s3 + $0x22] ss:$0 sm:$0xff]  ;;  %v3149_v6 = vld [vmem:[%s4502_s3 + $0x23] ss:$0 sm:$0xff] }
 0xef7   :  { %3618 = vmatprep.mubr.msk.bf16.mxu1 %vm3812_vm1, %v3809_v22  ;;  %3603 = vmatpush3.bf16.msra.mxu1 %v3691_v55 }
 0xef8   :  { %3604 = vmatprep.subr.bf16.mxu1 %v3809_v22 }
 0xefb   :  { %3605 = vmatpush3.bf16.msra.mxu1 %v3692_v56 }
 0xefc   :  { %3606 = vmatprep.subr.bf16.mxu1 %v3809_v22 }
 0xeff   :  { %3607 = vmatpush3.bf16.msra.mxu1 %v3693_v57 }
 0xf00   :  { %3608 = vmatprep.subr.bf16.mxu1 %v3809_v22 }
 0xf03   :  { %3609 = vmatpush3.bf16.msra.mxu1 %v3694_v58 }
 0xf04   :  { %3610 = vmatprep.subr.bf16.mxu1 %v3809_v22 }
 0xf07   :  { %3611 = vmatpush3.bf16.msra.mxu1 %v3695_v2  ;;  %v3152_v2 = vld [vmem:[%s4502_s3 + $0x26] ss:$0 sm:$0xff] }
 0xf08   :  { %3612 = vmatprep.subr.bf16.mxu1 %v3809_v22 }
 0xf0b   :  { %3613 = vmatpush3.bf16.msra.mxu1 %v3696_v59 }
 0xf0c   :  { %3614 = vmatprep.subr.bf16.mxu1 %v3809_v22 }
 0xf2e   :  { %v2564_v8 = vpop.f32.mrb[80].mxu0 }
 0xf2f   :  { %v3570_v10 = vpop.f32.mrb[81].mxu0  ;;  %v2571_v16 = vadd.f32 %v3147_v15, %v2564_v8 }
 0xf30   :  { %v2567_v13 = vpop.f32.mrb[82].mxu0 }
 0xf31   :  { %v3571_v14 = vpop.f32.mrb[83].mxu0  ;;  %v2572_v18 = vadd.f32 %v3147_v15, %v2567_v13  ;;  %v3698_v15 = vld [vmem:[%s4501_s2 + $0x78] sm:$0xff]  }
 0xf32   :  { %v3697_v14 = vld [vmem:[%s4501_s2 + $0x70] sm:$0xff]  }
 0xf33   :  { %3615 = vmatpush3.bf16.msra.mxu1 %v3697_v14 }
 0xf34   :  { %3616 = vmatprep.subr.bf16.mxu1 %v3809_v22 }
 0xf37   :  { %3617 = vmatpush3.bf16.msra.mxu1 %v3698_v15 }
 0xf8b   :  { %v2617_v17 = vpop.f32.mrb[80].mxu1 }
 0xf8c   :  { %v2624_v19 = vadd.f32 %v2617_v17, %v2571_v16  ;;  %v3576_v20 = vpop.f32.mrb[81].mxu1  ;;  %v3150_v16 = vld [vmem:[%s4502_s3 + $0x24] ss:$0 sm:$0xff] }
 0xf8d   :  { %v2620_v21 = vpop.f32.mrb[82].mxu1 }
 0xf8e   :  { %v2625_v23 = vadd.f32 %v2620_v21, %v2572_v18  ;;  %v3577_v24 = vpop.f32.mrb[83].mxu1 }
 0xfc1   :  { %v2670_v9 = vpop.f32.mrb[84].mxu0 }
 0xfc2   :  { %v2677_v25 = vadd.f32 %v2670_v9, %v2624_v19  ;;  %v3582_v26 = vpop.f32.mrb[85].mxu0 }
 0xfc3   :  { %v2673_v27 = vpop.f32.mrb[86].mxu0  ;;  %v3151_v26 = vld [vmem:[%s4502_s3 + $0x25] ss:$0 sm:$0xff] }
 0xfc4   :  { %v2678_v28 = vadd.f32 %v2673_v27, %v2625_v23  ;;  %v3583_v29 = vpop.f32.mrb[87].mxu0 }
 0xfc9   :  { %v2723_v30 = vpop.f32.mrb[84].mxu1 }
 0xfca   :  { %v2730_v31 = vadd.f32 %v2723_v30, %v2677_v25  ;;  %v3588_v32 = vpop.f32.mrb[85].mxu1 }
 0xfcb   :  { %v2726_v33 = vpop.f32.mrb[86].mxu1 }
 0xfcc   :  { %v2731_v34 = vadd.f32 %v2726_v33, %v2678_v28  ;;  %v3589_v35 = vpop.f32.mrb[87].mxu1  ;;  %v2732_v36 = vadd.f32 %v2730_v31, %v4191_v49 }
 0xfce   :  { %v2734_v37 = vsel %vm123_vm0, %v2732_v36, 0.0  ;;  %v2733_v51 = vadd.f32 %v2731_v34, %v4193_v50  ;;  %v3687_v50 = vld [vmem:[%s4500_s1 + $0xa8] ss:$20 sps:$4 sm:$0xff]  }
 0xfcf   :  { %2735 = vadd.xlane.f32.xlu0 %v2734_v37  ;;  %3591 = vmatpush3.bf16.msra.mxu0 %v3687_v50  ;;  %v3702_v50 = vld [vmem:[%s4500_s1 + $0x88] ss:$20 sps:$4 sm:$0xff]  }
 0xfd0   :  { %v2737_v48 = vsel %vm123_vm0, %v2733_v51, 0.0  ;;  %3592 = vmatprep.subr.bf16.mxu0 %v3809_v22 }
 0xfd1   :  { %2738 = vadd.xlane.f32.xlu1 %v2737_v48 }
 0xfd3   :  { %3593 = vmatpush3.bf16.msra.mxu0 %v3688_v52 }
 0xfd4   :  { %3594 = vmatprep.subr.bf16.mxu0 %v3809_v22 }
 0xfd7   :  { %3595 = vmatpush3.bf16.msra.mxu0 %v3689_v53 }
 0xfd8   :  { %3596 = vmatprep.subr.bf16.mxu0 %v3809_v22 }
 0xfdb   :  { %3597 = vmatpush3.bf16.msra.mxu0 %v3690_v54 }
 0xfdc   :  { %3622 = vmatprep.subr.bf16.mxu0 %v3809_v22 }
0x105c   :  { %v2736_v38 = vpop.xlane.xlu0 %2735 }
0x105d   :  { %v2740_v40 = vmul.f32 0.015625, %v2736_v38 }
0x105e   :  { %v2739_v41 = vpop.xlane.xlu1 %2738 }
0x105f   :  { %v2742_v42 = vsub.f32 %v2732_v36, %v2740_v40  ;;  %v2741_v43 = vmul.f32 0.015625, %v2739_v41 }
0x1061   :  { %v2743_v44 = vsub.f32 %v2733_v51, %v2741_v43  ;;  %v2744_v45 = vmul.f32 %v2742_v42, %v2742_v42 }
0x1063   :  { %v2746_v46 = vsel %vm123_vm0, %v2744_v45, 0.0  ;;  %v2745_v47 = vmul.f32 %v2743_v44, %v2743_v44 }
0x1064   :  { %2747 = vadd.xlane.f32.xlu0 %v2746_v46  ;;  %v3699_v46 = vld [vmem:[%s4500_s1 + $0x10] ss:$20 sps:$4 sm:$0xff]  }
0x1065   :  { %v2749_v49 = vsel %vm123_vm0, %v2745_v47, 0.0  ;;  %v3700_v47 = vld [vmem:[%s4500_s1 + $0x38] ss:$20 sps:$4 sm:$0xff]  }
0x1068   :  { %2750 = vadd.xlane.f32.xlu0 %v2749_v49  ;;  %v3701_v49 = vld [vmem:[%s4500_s1 + $0x60] ss:$20 sps:$4 sm:$0xff]  }
0x10f1   :  { %v2748_v60 = vpop.xlane.xlu0 %2747 }
0x10f2   :  { %v2752_v61 = vmul.f32 0.015625, %v2748_v60 }
0x10f4   :  { %v2754_v12 = vadd.f32 1e-05, %v2752_v61 }
0x10f5   :  { %v2751_v62 = vpop.xlane.xlu0 %2750 }
0x10f6   :  { %3776 = vrsqrt.f32 %v2754_v12  ;;  %v2753_v63 = vmul.f32 0.015625, %v2751_v62 }
0x10f8   :  { %v2755_v0 = vadd.f32 1e-05, %v2753_v63 }
0x10fa   :  { %3778 = vrsqrt.f32 %v2755_v0 }
0x1100   :  { %v3777_v1 = vpop.eup %3776 }
0x1101   :  { %v2758_v3 = vmul.f32 %v3777_v1, %v2742_v42 }
0x1103   :  { %v2760_v39 = vmul.f32 %v3148_v4, %v2758_v3 }
0x1104   :  { %v3779_v5 = vpop.eup %3778 }
0x1105   :  { %v2759_v11 = vmul.f32 %v3779_v5, %v2743_v44  ;;  %v2762_v8 = vadd.f32 %v3149_v6, %v2760_v39 }
0x1107   :  { %v2761_v7 = vmul.f32 %v3148_v4, %v2759_v11 }
0x1109   :  { %v2763_v10 = vadd.f32 %v3149_v6, %v2761_v7 }
0x110b   :  { %v2764_v13 = vpack.c.bf16 %v2763_v10, %v2762_v8 }
0x110d   :  { %3599 = vmatmul.mubr.msk.bf16.vlgmr.msra.gmra.mrb[88].mxu0 %vm123_vm0, %v2764_v13 }
0x110e   :  { %3630 = vmatprep.mubr.msk.bf16.mxu0 %vm3812_vm1, %v3809_v22  ;;  %3623 = vmatpush3.bf16.msra.mxu0 %v3699_v46 }
0x110f   :  { %3624 = vmatprep.subr.bf16.mxu0 %v3809_v22 }
0x1112   :  { %3625 = vmatpush3.bf16.msra.mxu0 %v3700_v47 }
0x1113   :  { %3626 = vmatprep.subr.bf16.mxu0 %v3809_v22 }
0x1116   :  { %3627 = vmatpush3.bf16.msra.mxu0 %v3701_v49 }
0x1117   :  { %3628 = vmatprep.subr.bf16.mxu0 %v3809_v22  ;;  %v3153_v22 = vld [vmem:[%s4502_s3 + $0x27] ss:$0 sm:$0xff] }
0x111a   :  { %3629 = vmatpush3.bf16.msra.mxu0 %v3702_v50 }
0x11e0   :  { %v2826_v17 = vpop.f32.mrb[88].mxu0 }
0x11e1   :  { %v2827_v18 = vadd.f32 %v3150_v16, %v2826_v17  ;;  %v3600_v19 = vpop.f32.mrb[89].mxu0 }
0x11e2   :  { %v2829_v20 = vpop.f32.mrb[90].mxu0 }
0x11e3   :  { %v2830_v21 = vadd.f32 %v3150_v16, %v2829_v20  ;;  %v3601_v23 = vpop.f32.mrb[91].mxu0  ;;  %v2833_v24 = vmax.f32 %v2827_v18, 0.0 }
0x11e5   :  { %v2834_v9 = vmax.f32 %v2830_v21, 0.0 }
0x11e7   :  { %v2835_v25 = vpack.c.bf16 %v2834_v9, %v2833_v24 }
0x11e9   :  { %3619 = vmatmul.mubr.bf16.vlgmr.msra.gmra.mrb[88].mxu1 %v2835_v25 }
0x12bc   :  { %v2918_v27 = vpop.f32.mrb[88].mxu1 }
0x12bd   :  { %v2919_v28 = vadd.f32 %v3151_v26, %v2918_v27  ;;  %v3620_v29 = vpop.f32.mrb[89].mxu1 }
0x12be   :  { %v2921_v30 = vpop.f32.mrb[90].mxu1 }
0x12bf   :  { %v2922_v31 = vadd.f32 %v3151_v26, %v2921_v30  ;;  %v3621_v32 = vpop.f32.mrb[91].mxu1  ;;  %v2925_v33 = vadd.f32 %v2919_v28, %v2762_v8  ;;  %v2965_v8 = vld [vmem:[%s4502_s3 + $0x10] ss:$0 sm:$0xff] }
0x12c1   :  { %v2927_v34 = vsel %vm123_vm0, %v2925_v33, 0.0  ;;  %v2926_v35 = vadd.f32 %v2922_v31, %v2763_v10 }
0x12c2   :  { %2928 = vadd.xlane.f32.xlu1 %v2927_v34 }
0x12c3   :  { %v2930_v36 = vsel %vm123_vm0, %v2926_v35, 0.0 }
0x12c4   :  { %2931 = vadd.xlane.f32.xlu0 %v2930_v36 }
0x134f   :  { %v2929_v37 = vpop.xlane.xlu1 %2928 }
0x1350   :  { %v2933_v51 = vmul.f32 0.015625, %v2929_v37 }
0x1351   :  { %v2932_v48 = vpop.xlane.xlu0 %2931 }
0x1352   :  { %v2935_v38 = vsub.f32 %v2925_v33, %v2933_v51  ;;  %v2934_v40 = vmul.f32 0.015625, %v2932_v48 }
0x1354   :  { %v2936_v41 = vsub.f32 %v2926_v35, %v2934_v40  ;;  %v2937_v42 = vmul.f32 %v2935_v38, %v2935_v38 }
0x1356   :  { %v2939_v43 = vsel %vm123_vm0, %v2937_v42, 0.0  ;;  %v2938_v44 = vmul.f32 %v2936_v41, %v2936_v41 }
0x1357   :  { %2940 = vadd.xlane.f32.xlu1 %v2939_v43 }
0x1358   :  { %v2942_v45 = vsel %vm123_vm0, %v2938_v44, 0.0 }
0x1359   :  { %2943 = vadd.xlane.f32.xlu0 %v2942_v45 }
0x13e4   :  { %v2941_v52 = vpop.xlane.xlu1 %2940 }
0x13e5   :  { %v2945_v53 = vmul.f32 0.015625, %v2941_v52 }
0x13e6   :  { %v2944_v54 = vpop.xlane.xlu0 %2943 }
0x13e7   :  { %v2947_v55 = vadd.f32 1e-05, %v2945_v53  ;;  %v2946_v56 = vmul.f32 0.015625, %v2944_v54 }
0x13e9   :  { %3780 = vrsqrt.f32 %v2947_v55  ;;  %v2948_v57 = vadd.f32 1e-05, %v2946_v56 }
0x13eb   :  { %3782 = vrsqrt.f32 %v2948_v57 }
0x13f3   :  { %v3781_v58 = vpop.eup %3780 }
0x13f4   :  { %v2951_v59 = vmul.f32 %v3781_v58, %v2935_v38 }
0x13f5   :  { %v3783_v60 = vpop.eup %3782 }
0x13f6   :  { %v2953_v61 = vmul.f32 %v3152_v2, %v2951_v59  ;;  %v2952_v12 = vmul.f32 %v3783_v60, %v2936_v41 }
0x13f8   :  { %v2955_v62 = vadd.f32 %v3153_v22, %v2953_v61  ;;  %v2954_v63 = vmul.f32 %v3152_v2, %v2952_v12 }
0x13fa   :  { %v2966_v0 = vpack.c.bf16 %v2955_v62, %v2955_v62  ;;  %v2956_v1 = vadd.f32 %v3153_v22, %v2954_v63 }
0x13fc   :  { %v2970_v3 = vunpack.c.l.b16 %v2966_v0  ;;  %v2967_v4 = vpack.c.bf16 %v2956_v1, %v2956_v1 }
0x13fe   :  { %v2971_v5 = vunpack.c.l.b16 %v2967_v4  ;;  %v2972_v39 = vrot.slane %v2970_v3, 7 }
0x1400   :  { %v2973_v11 = vrot.slane %v2971_v5, 6 }
0x1402   :  { %v2975_v6 = vsel %vm2974_vm5, %v2973_v11, %v2972_v39 }
0x1403   :  { %v2976_v7 = vpack.c.b16 %v2975_v6, %v2975_v6 }
0x1405   :  { %3631 = vmatmul.mubr.msk.bf16.vlgmr.msra.gmra.mrb[92].mxu0 %vm123_vm0, %v2976_v7 }
0x14d8   :  { %v3038_v10 = vpop.f32.mrb[92].mxu0 }
0x14d9   :  { %v3039_v13 = vadd.f32 %v3038_v10, %v2965_v8  ;;  %v3632_v14 = vpop.f32.mrb[93].mxu0 }
0x14da   :  { %v3041_v15 = vpop.f32.mrb[94].mxu0 }
0x14db   :  { %3044 = vst [vmem:[#allocation2] sm:$0x3] %v3039_v13  ;;  %v3633_v16 = vpop.f32.mrb[95].mxu0 }
0x14dc   :  { %3795 = shalt.err (!%p3792_p4)
}
0x14dd   :  { %s3796_s3 = scalar_lea.hbm %s4503_s4, 32 }
0x14de   :  { %p3797_p5 = scmp.ne.s32.totalorder %s4503_s4, %s3796_s3  ;;  %p3800_p6 = scmp.lt.u32.totalorder %s3796_s3, %s4503_s4 }
0x14e0   :  { %p3802_p7 = pnand %p3800_p6, %p3797_p5 }
0x14e2   :  { %3805 = shalt.err (!%p3802_p7)
}
0x14e3   :  { %3054 = dma.vmem_to_hbm [thread:$0]  %s3052_s9, 32, %s4503_s4, [#allocation3]  }
0x14e4   :  { %3806 = dma.done.wait [#allocation3], 32  }
0x14e5   :  { %3807 = vsyncadd [#allocation3], 4294967264 }
0x14e6   :  { %3058 = vsyncpa [#allocation3], 1 }

</bundles_post_ra>
